<compile_context>
chip_gen: v7x
topology: tpu7x:2x2x1
jax: 0.10.0
libtpu: 0.0.40
codegen_flags: <defaults>
</compile_context>

<pallas_src>
import jax
import jax.numpy as jnp
import numpy as np
from jax.experimental import pallas as pl
from jax.experimental.pallas import tpu as pltpu


# K-tile for the attention-input projection (real atten_dim = 4*12*115*115,
# so the f32 weight is ~240 MB and MUST be streamed tile-by-tile).
TK_ATT = 512


def _leaky(x, slope):
    return jnp.where(x >= 0, x, slope * x)


# ---------------------------------------------------------------------------
# Kernel 1: 1x1 Conv2d == per-pixel matmul over channels
# ---------------------------------------------------------------------------
def _conv1x1_kernel(x_ref, w_ref, b_ref, o_ref):
    # x: (P, Cin) f32, w: (Cin, Cout) bf16, b: (1, Cout) f32 -> o: (P, Cout) f32
    y = jnp.dot(x_ref[...].astype(jnp.bfloat16), w_ref[...],
                preferred_element_type=jnp.float32)
    o_ref[...] = (y + b_ref[...]).astype(o_ref.dtype)


def conv1x1(x_pix, w, b):
    P, Cin = x_pix.shape
    Cout = w.shape[1]
    return pl.pallas_call(
        _conv1x1_kernel,
        out_shape=jax.ShapeDtypeStruct((P, Cout), jnp.float32),
        grid=(1,),
        in_specs=[
            pl.BlockSpec((P, Cin), lambda i: (0, 0)),
            pl.BlockSpec((Cin, Cout), lambda i: (0, 0)),
            pl.BlockSpec((1, Cout), lambda i: (0, 0)),
        ],
        out_specs=pl.BlockSpec((P, Cout), lambda i: (0, 0)),
        compiler_params=pltpu.CompilerParams(dimension_semantics=("arbitrary",)),
    )(x_pix, w, b)


# ---------------------------------------------------------------------------
# Kernel 2: fused rest of the network
#   grid axis = K-tiles of the attention projection ("arbitrary" reduction)
# ---------------------------------------------------------------------------
def _fused_kernel(att_ref, w_att_ref, b_att_ref,
                  im_ref, w_im_ref, b_im_ref,
                  q_ref, w_q_ref, b_q_ref,
                  qc_ref, w_qc_ref, b_qc_ref,
                  ans_ref, w_ans_ref, b_ans_ref,
                  wc_att_ref, wc_im_ref, wc_q_ref, wc_qc_ref, wc_ans_ref,
                  bc_ref, out_ref, acc_ref):
    k = pl.program_id(0)

    @pl.when(k == 0)
    def _():
        acc_ref[...] = jnp.zeros_like(acc_ref)

    # Stream one (B, TK) x (TK, H) slab of the attention projection per step.
    acc_ref[...] += jnp.dot(att_ref[...].astype(jnp.bfloat16), w_att_ref[...],
                            preferred_element_type=jnp.float32)

    # Everything else (small) only once, on the last K-tile.
    @pl.when(k == pl.num_programs(0) - 1)
    def _():
        bf16, f32 = jnp.bfloat16, jnp.float32

        def proj(x_ref, w_ref, b_ref, slope):
            y = jnp.dot(x_ref[...].astype(bf16), w_ref[...],
                        preferred_element_type=f32) + b_ref[...]
            return _leaky(y, slope)

        att_feats = _leaky(acc_ref[...] + b_att_ref[...], 0.1)
        im_feats = proj(im_ref, w_im_ref, b_im_ref, 0.01)   # nn.LeakyReLU() default
        q_feats = proj(q_ref, w_q_ref, b_q_ref, 0.1)
        qc_feats = proj(qc_ref, w_qc_ref, b_qc_ref, 0.1)
        ans_feats = proj(ans_ref, w_ans_ref, b_ans_ref, 0.1)

        # concat + Linear(5H, 1) == sum over row-split weight chunks (no concat).
        logit = (jnp.sum(att_feats * wc_att_ref[...], axis=-1, keepdims=True)
                 + jnp.sum(im_feats * wc_im_ref[...], axis=-1, keepdims=True)
                 + jnp.sum(q_feats * wc_q_ref[...], axis=-1, keepdims=True)
                 + jnp.sum(qc_feats * wc_qc_ref[...], axis=-1, keepdims=True)
                 + jnp.sum(ans_feats * wc_ans_ref[...], axis=-1, keepdims=True)
                 + bc_ref[...])
        out_ref[...] = (1.0 / (1.0 + jnp.exp(-logit))).astype(out_ref.dtype)


def fused_tail(att_pad, im_flat, q, qc, ans, params):
    B, K_pad = att_pad.shape
    H = params["b_att"].shape[-1]
    K_im, K_q, K_qc, K_ans = (im_flat.shape[1], q.shape[1], qc.shape[1], ans.shape[1])
    assert K_pad % TK_ATT == 0
    n_k = K_pad // TK_ATT

    _c = lambda k: (0, 0)  # resident (constant-index) blocks: DMA'd once
    in_specs = [
        pl.BlockSpec((B, TK_ATT), lambda k: (0, k)),      # attention  (K-tiled)
        pl.BlockSpec((TK_ATT, H), lambda k: (k, 0)),      # W_att      (K-tiled, bf16)
        pl.BlockSpec((1, H), _c),                         # b_att
        pl.BlockSpec((B, K_im), _c),                      # im_flat
        pl.BlockSpec((K_im, H), _c),                      # W_im (bf16)
        pl.BlockSpec((1, H), _c),                         # b_im
        pl.BlockSpec((B, K_q), _c),                       # q_feat
        pl.BlockSpec((K_q, H), _c),                       # W_q (bf16)
        pl.BlockSpec((1, H), _c),                         # b_q
        pl.BlockSpec((B, K_qc), _c),                      # q_cap_feat
        pl.BlockSpec((K_qc, H), _c),                      # W_qcap (bf16)
        pl.BlockSpec((1, H), _c),                         # b_qcap
        pl.BlockSpec((B, K_ans), _c),                     # ans_scores
        pl.BlockSpec((K_ans, H), _c),                     # W_ans (bf16)
        pl.BlockSpec((1, H), _c),                         # b_ans
        pl.BlockSpec((1, H), _c),                         # corr weight chunk: att
        pl.BlockSpec((1, H), _c),                         # corr weight chunk: im
        pl.BlockSpec((1, H), _c),                         # corr weight chunk: q
        pl.BlockSpec((1, H), _c),                         # corr weight chunk: q_cap
        pl.BlockSpec((1, H), _c),                         # corr weight chunk: ans
        pl.BlockSpec((1, 1), _c),                         # corr bias
    ]
    return pl.pallas_call(
        _fused_kernel,
        out_shape=jax.ShapeDtypeStruct((B, 1), jnp.float32),
        grid=(n_k,),
        in_specs=in_specs,
        out_specs=pl.BlockSpec((B, 1), _c),
        scratch_shapes=[pltpu.VMEM((B, H), jnp.float32)],
        compiler_params=pltpu.CompilerParams(dimension_semantics=("arbitrary",)),
    )(att_pad, params["w_att"], params["b_att"],
      im_flat, params["w_im"], params["b_im"],
      q, params["w_q"], params["b_q"],
      qc, params["w_qc"], params["b_qc"],
      ans, params["w_ans"], params["b_ans"],
      params["wc_att"], params["wc_im"], params["wc_q"], params["wc_qc"],
      params["wc_ans"], params["b_corr"])


# ---------------------------------------------------------------------------
# Parameter init (PyTorch nn.Linear/Conv2d default: U(+-1/sqrt(fan_in)))
# ---------------------------------------------------------------------------
def _init_linear(key, in_f, out_f, pad_in_to=None):
    kw, kb = jax.random.split(key)
    bound = 1.0 / np.sqrt(in_f)
    w = jax.random.uniform(kw, (in_f, out_f), jnp.float32, -bound, bound)
    if pad_in_to is not None and pad_in_to > in_f:
        w = jnp.pad(w, ((0, pad_in_to - in_f), (0, 0)))   # zero rows: no-op in matmul
    b = jax.random.uniform(kb, (1, out_f), jnp.float32, -bound, bound)
    return w.astype(jnp.bfloat16), b


def init_params(key, atten_dim, hidden, q_feat_dim, im_feat_dim, conv_out_ch, ans_dim):
    hs, ws, cin = im_feat_dim
    keys = jax.random.split(key, 12)
    p = {}
    p["w_conv"], p["b_conv"] = _init_linear(keys[0], cin, conv_out_ch)
    k_att_pad = TK_ATT * int(np.ceil(atten_dim / TK_ATT))
    p["w_att"], p["b_att"] = _init_linear(keys[1], atten_dim, hidden, pad_in_to=k_att_pad)
    p["w_im"], p["b_im"] = _init_linear(keys[2], hs * ws * conv_out_ch, hidden)
    p["w_q"], p["b_q"] = _init_linear(keys[3], q_feat_dim, hidden)
    p["w_qc"], p["b_qc"] = _init_linear(keys[4], q_feat_dim, hidden)
    p["w_ans"], p["b_ans"] = _init_linear(keys[5], ans_dim, hidden)
    bound = 1.0 / np.sqrt(5 * hidden)
    for i, name in enumerate(["wc_att", "wc_im", "wc_q", "wc_qc", "wc_ans"]):
        p[name] = jax.random.uniform(keys[6 + i], (1, hidden), jnp.float32, -bound, bound)
    p["b_corr"] = jax.random.uniform(keys[11], (1, 1), jnp.float32, -bound, bound)
    return p


# ---------------------------------------------------------------------------
# Forward pass (matches quescaptionmatch_failurepred.forward)
# ---------------------------------------------------------------------------
@jax.jit
def forward(params, attention, im_feat, q_feat, q_cap_feat, ans_scores):
    B, Cin, Hs, Ws = im_feat.shape
    Cout = params["w_conv"].shape[1]

    # --- 1x1 conv (Pallas kernel #1): NCHW -> pixel rows -> matmul ---
    pix = jnp.transpose(im_feat, (0, 2, 3, 1)).reshape(B * Hs * Ws, Cin)
    conv_pix = conv1x1(pix, params["w_conv"], params["b_conv"])          # (B*HW, Cout)
    im_feature = conv_pix.reshape(B, Hs, Ws, Cout).transpose(0, 3, 1, 2)  # NCHW, returned
    im_flat = im_feature.reshape(B, Cout * Hs * Ws)                       # torch .view order

    # --- fused tail (Pallas kernel #2) ---
    K_att = attention.shape[1]
    K_pad = params["w_att"].shape[0]
    att_pad = attention if K_pad == K_att else jnp.pad(
        attention, ((0, 0), (0, K_pad - K_att)))

    corr_pred = fused_tail(att_pad, im_flat, q_feat, q_cap_feat, ans_scores, params)
    return {"wrong_pred": corr_pred, "im_feature": [im_feature]}


# ---------------------------------------------------------------------------
# Pure-JAX reference (same bf16 weight casts) for correctness checking
# ---------------------------------------------------------------------------
def reference(params, attention, im_feat, q_feat, q_cap_feat, ans_scores):
    bf16, f32 = jnp.bfloat16, jnp.float32

    def lin(x, w, b, slope):
        y = jnp.dot(x.astype(bf16), w, preferred_element_type=f32) + b
        return jnp.where(y >= 0, y, slope * y)

    B, Cin, Hs, Ws = im_feat.shape
    Cout = params["w_conv"].shape[1]
    pix = jnp.transpose(im_feat, (0, 2, 3, 1)).reshape(B * Hs * Ws, Cin)
    conv = jnp.dot(pix.astype(bf16), params["w_conv"],
                   preferred_element_type=f32) + params["b_conv"]
    im_feature = conv.reshape(B, Hs, Ws, Cout).transpose(0, 3, 1, 2)
    im_flat = im_feature.reshape(B, -1)

    att_f = lin(attention, params["w_att"][: attention.shape[1]], params["b_att"], 0.1)
    im_f = lin(im_flat, params["w_im"], params["b_im"], 0.01)
    q_f = lin(q_feat, params["w_q"], params["b_q"], 0.1)
    qc_f = lin(q_cap_feat, params["w_qc"], params["b_qc"], 0.1)
    ans_f = lin(ans_scores, params["w_ans"], params["b_ans"], 0.1)

    concat = jnp.concatenate([att_f, im_f, q_f, qc_f, ans_f], axis=1)
    wc_full = jnp.concatenate([params["wc_att"], params["wc_im"], params["wc_q"],
                               params["wc_qc"], params["wc_ans"]], axis=1)  # (1, 5H)
    logit = jnp.dot(concat, wc_full.T,
                    precision=jax.lax.Precision.HIGHEST) + params["b_corr"]
    return {"wrong_pred": jax.nn.sigmoid(logit), "im_feature": [im_feature]}


# ---------------------------------------------------------------------------
# Main
# ---------------------------------------------------------------------------
if __name__ == "__main__":
    # Small, module-consistent test shapes (real defaults are huge:
    # atten_dim=4*12*115*115, im_feat_dim=(7,7,2048), conv_out=1024, ans=3129).
    batch = 2
    hidden = 32            # hidden_feat_size (default 96)
    atten_dim = 1536       # 3 K-tiles of TK_ATT=512 -> exercises the grid loop
    q_feat_dim = 64        # stands in for 300
    im_hw = 7
    im_cin = 128           # stands in for 2048
    conv_cout = 64         # stands in for 1024
    ans_dim = 256          # stands in for 3129

    key = jax.random.PRNGKey(0)
    kp, k1, k2, k3, k4, k5 = jax.random.split(key, 6)
    params = init_params(kp, atten_dim, hidden, q_feat_dim,
                         (im_hw, im_hw, im_cin), conv_cout, ans_dim)

    attention = jax.random.normal(k1, (batch, atten_dim), jnp.float32)
    im_feat = jax.random.normal(k2, (batch, im_cin, im_hw, im_hw), jnp.float32)
    q_feat = jax.random.normal(k3, (batch, q_feat_dim), jnp.float32)
    q_cap_feat = jax.random.normal(k4, (batch, q_feat_dim), jnp.float32)
    ans_scores = jax.random.normal(k5, (batch, ans_dim), jnp.float32)

    out = forward(params, attention, im_feat, q_feat, q_cap_feat, ans_scores)
    jax.block_until_ready(out)

    ref = reference(params, attention, im_feat, q_feat, q_cap_feat, ans_scores)

    corr = np.asarray(out["wrong_pred"])
    assert corr.shape == (batch, 1)
    assert np.all(corr > 0.0) and np.all(corr < 1.0)
    assert np.asarray(out["im_feature"][0]).shape == (batch, conv_cout, im_hw, im_hw)
    np.testing.assert_allclose(corr, np.asarray(ref["wrong_pred"]),
                               atol=3e-3, rtol=3e-3)
    np.testing.assert_allclose(np.asarray(out["im_feature"][0]),
                               np.asarray(ref["im_feature"][0]),
                               atol=3e-3, rtol=3e-3)

    print("KERNEL_OK")
</pallas_src>

<mosaic_0001>
module attributes {stable_mosaic.version = 11 : i64} {
  func.func @_conv1x1_kernel(%arg0: i32, %arg1: memref<98x128xf32, #tpu.memory_space<vmem>>, %arg2: memref<128x64xbf16, #tpu.memory_space<vmem>>, %arg3: memref<1x64xf32, #tpu.memory_space<vmem>>, %arg4: memref<98x64xf32, #tpu.memory_space<vmem>>) attributes {dimension_semantics = [#tpu.dimension_semantics<arbitrary>], iteration_bounds = array<i64: 1>, scalar_prefetch = 0 : i64, scratch_operands = 0 : i64, tpu.core_type = #tpu.core_type<tc>, window_params = [{pipeline_mode = #tpu.pipeline_mode<synchronous>, transform_indices = @transform_0, window_bounds = array<i64: 98, 128>}, {pipeline_mode = #tpu.pipeline_mode<synchronous>, transform_indices = @transform_1, window_bounds = array<i64: 128, 64>}, {pipeline_mode = #tpu.pipeline_mode<synchronous>, transform_indices = @transform_2, window_bounds = array<i64: 1, 64>}, {pipeline_mode = #tpu.pipeline_mode<synchronous>, transform_indices = @transform_3, window_bounds = array<i64: 98, 64>}]} {
    %c0 = arith.constant 0 : index
    %c0_0 = arith.constant 0 : index
    %0 = vector.load %arg1[%c0, %c0_0] : memref<98x128xf32, #tpu.memory_space<vmem>>, vector<98x128xf32>
    %1 = arith.truncf %0 : vector<98x128xf32> to vector<98x128xbf16>
    %c0_1 = arith.constant 0 : index
    %c0_2 = arith.constant 0 : index
    %2 = vector.load %arg2[%c0_1, %c0_2] : memref<128x64xbf16, #tpu.memory_space<vmem>>, vector<128x64xbf16>
    %cst = arith.constant dense<0.000000e+00> : vector<98x64xf32>
    %3 = tpu.matmul %1, %2, %cst {dimension_numbers = #tpu.dot_dimension_numbers<[1], [0], [0], [1], [0, 0, 1, 1], [], []>} : vector<98x128xbf16>, vector<128x64xbf16>, vector<98x64xf32> -> vector<98x64xf32>
    %c0_3 = arith.constant 0 : index
    %c0_4 = arith.constant 0 : index
    %4 = vector.load %arg3[%c0_3, %c0_4] : memref<1x64xf32, #tpu.memory_space<vmem>>, vector<1x64xf32>
    %5 = vector.broadcast %4 : vector<1x64xf32> to vector<98x64xf32>
    %6 = arith.addf %3, %5 : vector<98x64xf32>
    %c0_5 = arith.constant 0 : index
    %c0_6 = arith.constant 0 : index
    %7 = vector.load %arg4[%c0_5, %c0_6] : memref<98x64xf32, #tpu.memory_space<vmem>>, vector<98x64xf32>
    tpu.vector_store %arg4[%c0_5, %c0_6], %6 {strides = array<i32>} : memref<98x64xf32, #tpu.memory_space<vmem>>, vector<98x64xf32>,
    return
  }
  func.func @transform_0(%arg0: i32) -> (i32, i32) {
    %c0_i32 = arith.constant 0 : i32
    %c0_i32_0 = arith.constant 0 : i32
    %c0_i32_1 = arith.constant 0 : i32
    return %c0_i32, %c0_i32_0 : i32, i32
  }
  func.func @transform_1(%arg0: i32) -> (i32, i32) {
    %c0_i32 = arith.constant 0 : i32
    %c0_i32_0 = arith.constant 0 : i32
    %c0_i32_1 = arith.constant 0 : i32
    return %c0_i32, %c0_i32_0 : i32, i32
  }
  func.func @transform_2(%arg0: i32) -> (i32, i32) {
    %c0_i32 = arith.constant 0 : i32
    %c0_i32_0 = arith.constant 0 : i32
    %c0_i32_1 = arith.constant 0 : i32
    return %c0_i32, %c0_i32_0 : i32, i32
  }
  func.func @transform_3(%arg0: i32) -> (i32, i32) {
    %c0_i32 = arith.constant 0 : i32
    %c0_i32_0 = arith.constant 0 : i32
    %c0_i32_1 = arith.constant 0 : i32
    return %c0_i32, %c0_i32_0 : i32, i32
  }
}

module attributes {stable_mosaic.version = 11 : i64} {
  func.func @_fused_kernel(%arg0: i32, %arg1: memref<2x512xf32, #tpu.memory_space<vmem>>, %arg2: memref<512x32xbf16, #tpu.memory_space<vmem>>, %arg3: memref<1x32xf32, #tpu.memory_space<vmem>>, %arg4: memref<2x3136xf32, #tpu.memory_space<vmem>>, %arg5: memref<3136x32xbf16, #tpu.memory_space<vmem>>, %arg6: memref<1x32xf32, #tpu.memory_space<vmem>>, %arg7: memref<2x64xf32, #tpu.memory_space<vmem>>, %arg8: memref<64x32xbf16, #tpu.memory_space<vmem>>, %arg9: memref<1x32xf32, #tpu.memory_space<vmem>>, %arg10: memref<2x64xf32, #tpu.memory_space<vmem>>, %arg11: memref<64x32xbf16, #tpu.memory_space<vmem>>, %arg12: memref<1x32xf32, #tpu.memory_space<vmem>>, %arg13: memref<2x256xf32, #tpu.memory_space<vmem>>, %arg14: memref<256x32xbf16, #tpu.memory_space<vmem>>, %arg15: memref<1x32xf32, #tpu.memory_space<vmem>>, %arg16: memref<1x32xf32, #tpu.memory_space<vmem>>, %arg17: memref<1x32xf32, #tpu.memory_space<vmem>>, %arg18: memref<1x32xf32, #tpu.memory_space<vmem>>, %arg19: memref<1x32xf32, #tpu.memory_space<vmem>>, %arg20: memref<1x32xf32, #tpu.memory_space<vmem>>, %arg21: memref<1x1xf32, #tpu.memory_space<vmem>>, %arg22: memref<2x1xf32, #tpu.memory_space<vmem>>, %arg23: memref<2x32xf32, #tpu.memory_space<vmem>>) attributes {dimension_semantics = [#tpu.dimension_semantics<arbitrary>], iteration_bounds = array<i64: 3>, scalar_prefetch = 0 : i64, scratch_operands = 1 : i64, tpu.core_type = #tpu.core_type<tc>, window_params = [{transform_indices = @transform_0, window_bounds = array<i64: 2, 512>}, {transform_indices = @transform_1, window_bounds = array<i64: 512, 32>}, {pipeline_mode = #tpu.pipeline_mode<synchronous>, transform_indices = @transform_2, window_bounds = array<i64: 1, 32>}, {pipeline_mode = #tpu.pipeline_mode<synchronous>, transform_indices = @transform_3, window_bounds = array<i64: 2, 3136>}, {pipeline_mode = #tpu.pipeline_mode<synchronous>, transform_indices = @transform_4, window_bounds = array<i64: 3136, 32>}, {pipeline_mode = #tpu.pipeline_mode<synchronous>, transform_indices = @transform_5, window_bounds = array<i64: 1, 32>}, {pipeline_mode = #tpu.pipeline_mode<synchronous>, transform_indices = @transform_6, window_bounds = array<i64: 2, 64>}, {pipeline_mode = #tpu.pipeline_mode<synchronous>, transform_indices = @transform_7, window_bounds = array<i64: 64, 32>}, {pipeline_mode = #tpu.pipeline_mode<synchronous>, transform_indices = @transform_8, window_bounds = array<i64: 1, 32>}, {pipeline_mode = #tpu.pipeline_mode<synchronous>, transform_indices = @transform_9, window_bounds = array<i64: 2, 64>}, {pipeline_mode = #tpu.pipeline_mode<synchronous>, transform_indices = @transform_10, window_bounds = array<i64: 64, 32>}, {pipeline_mode = #tpu.pipeline_mode<synchronous>, transform_indices = @transform_11, window_bounds = array<i64: 1, 32>}, {pipeline_mode = #tpu.pipeline_mode<synchronous>, transform_indices = @transform_12, window_bounds = array<i64: 2, 256>}, {pipeline_mode = #tpu.pipeline_mode<synchronous>, transform_indices = @transform_13, window_bounds = array<i64: 256, 32>}, {pipeline_mode = #tpu.pipeline_mode<synchronous>, transform_indices = @transform_14, window_bounds = array<i64: 1, 32>}, {pipeline_mode = #tpu.pipeline_mode<synchronous>, transform_indices = @transform_15, window_bounds = array<i64: 1, 32>}, {pipeline_mode = #tpu.pipeline_mode<synchronous>, transform_indices = @transform_16, window_bounds = array<i64: 1, 32>}, {pipeline_mode = #tpu.pipeline_mode<synchronous>, transform_indices = @transform_17, window_bounds = array<i64: 1, 32>}, {pipeline_mode = #tpu.pipeline_mode<synchronous>, transform_indices = @transform_18, window_bounds = array<i64: 1, 32>}, {pipeline_mode = #tpu.pipeline_mode<synchronous>, transform_indices = @transform_19, window_bounds = array<i64: 1, 32>}, {pipeline_mode = #tpu.pipeline_mode<synchronous>, transform_indices = @transform_20, window_bounds = array<i64: 1, 1>}, {pipeline_mode = #tpu.pipeline_mode<synchronous>, transform_indices = @transform_21, window_bounds = array<i64: 2, 1>}]} {
    %c0_i32 = arith.constant 0 : i32
    %0 = arith.cmpi eq, %arg0, %c0_i32 : i32
    %1 = arith.extui %0 : i1 to i32
    %c0_i32_0 = arith.constant 0 : i32
    %2 = arith.cmpi ne, %1, %c0_i32_0 : i32
    scf.if %2 {
      %cst_9 = arith.constant 0.000000e+00 : f32
      %13 = vector.broadcast %cst_9 : f32 to vector<2x32xf32>
      %c0_10 = arith.constant 0 : index
      %c0_11 = arith.constant 0 : index
      %14 = vector.load %arg23[%c0_10, %c0_11] : memref<2x32xf32, #tpu.memory_space<vmem>>, vector<2x32xf32>
      tpu.vector_store %arg23[%c0_10, %c0_11], %13 {strides = array<i32>} : memref<2x32xf32, #tpu.memory_space<vmem>>, vector<2x32xf32>,
    } else {
    }
    %c0 = arith.constant 0 : index
    %c0_1 = arith.constant 0 : index
    %3 = vector.load %arg23[%c0, %c0_1] : memref<2x32xf32, #tpu.memory_space<vmem>>, vector<2x32xf32>
    %c0_2 = arith.constant 0 : index
    %c0_3 = arith.constant 0 : index
    %4 = vector.load %arg1[%c0_2, %c0_3] : memref<2x512xf32, #tpu.memory_space<vmem>>, vector<2x512xf32>
    %5 = arith.truncf %4 : vector<2x512xf32> to vector<2x512xbf16>
    %c0_4 = arith.constant 0 : index
    %c0_5 = arith.constant 0 : index
    %6 = vector.load %arg2[%c0_4, %c0_5] : memref<512x32xbf16, #tpu.memory_space<vmem>>, vector<512x32xbf16>
    %cst = arith.constant dense<0.000000e+00> : vector<2x32xf32>
    %7 = tpu.matmul %5, %6, %cst {dimension_numbers = #tpu.dot_dimension_numbers<[1], [0], [0], [1], [0, 0, 1, 1], [], []>} : vector<2x512xbf16>, vector<512x32xbf16>, vector<2x32xf32> -> vector<2x32xf32>
    %8 = arith.addf %3, %7 : vector<2x32xf32>
    %c0_6 = arith.constant 0 : index
    %c0_7 = arith.constant 0 : index
    %9 = vector.load %arg23[%c0_6, %c0_7] : memref<2x32xf32, #tpu.memory_space<vmem>>, vector<2x32xf32>
    tpu.vector_store %arg23[%c0_6, %c0_7], %8 {strides = array<i32>} : memref<2x32xf32, #tpu.memory_space<vmem>>, vector<2x32xf32>,
    %c2_i32 = arith.constant 2 : i32
    %10 = arith.cmpi eq, %arg0, %c2_i32 : i32
    %11 = arith.extui %10 : i1 to i32
    %c0_i32_8 = arith.constant 0 : i32
    %12 = arith.cmpi ne, %11, %c0_i32_8 : i32
    scf.if %12 {
      %c0_9 = arith.constant 0 : index
      %c0_10 = arith.constant 0 : index
      %13 = vector.load %arg23[%c0_9, %c0_10] : memref<2x32xf32, #tpu.memory_space<vmem>>, vector<2x32xf32>
      %c0_11 = arith.constant 0 : index
      %c0_12 = arith.constant 0 : index
      %14 = vector.load %arg3[%c0_11, %c0_12] : memref<1x32xf32, #tpu.memory_space<vmem>>, vector<1x32xf32>
      %15 = vector.broadcast %14 : vector<1x32xf32> to vector<2x32xf32>
      %16 = arith.addf %13, %15 : vector<2x32xf32>
      %cst_13 = arith.constant 0.000000e+00 : f32
      %17 = vector.broadcast %cst_13 : f32 to vector<2x32xf32>
      %18 = arith.cmpf oge, %16, %17 : vector<2x32xf32>
      %cst_14 = arith.constant 1.000000e-01 : f32
      %19 = vector.broadcast %cst_14 : f32 to vector<2x32xf32>
      %20 = arith.mulf %19, %16 : vector<2x32xf32>
      %21 = arith.select %18, %16, %20 : vector<2x32xi1>, vector<2x32xf32>
      %c0_15 = arith.constant 0 : index
      %c0_16 = arith.constant 0 : index
      %22 = vector.load %arg4[%c0_15, %c0_16] : memref<2x3136xf32, #tpu.memory_space<vmem>>, vector<2x3136xf32>
      %23 = arith.truncf %22 : vector<2x3136xf32> to vector<2x3136xbf16>
      %c0_17 = arith.constant 0 : index
      %c0_18 = arith.constant 0 : index
      %24 = vector.load %arg5[%c0_17, %c0_18] : memref<3136x32xbf16, #tpu.memory_space<vmem>>, vector<3136x32xbf16>
      %cst_19 = arith.constant dense<0.000000e+00> : vector<2x32xf32>
      %25 = tpu.matmul %23, %24, %cst_19 {dimension_numbers = #tpu.dot_dimension_numbers<[1], [0], [0], [1], [0, 0, 1, 1], [], []>} : vector<2x3136xbf16>, vector<3136x32xbf16>, vector<2x32xf32> -> vector<2x32xf32>
      %c0_20 = arith.constant 0 : index
      %c0_21 = arith.constant 0 : index
      %26 = vector.load %arg6[%c0_20, %c0_21] : memref<1x32xf32, #tpu.memory_space<vmem>>, vector<1x32xf32>
      %27 = vector.broadcast %26 : vector<1x32xf32> to vector<2x32xf32>
      %28 = arith.addf %25, %27 : vector<2x32xf32>
      %cst_22 = arith.constant 0.000000e+00 : f32
      %29 = vector.broadcast %cst_22 : f32 to vector<2x32xf32>
      %30 = arith.cmpf oge, %28, %29 : vector<2x32xf32>
      %cst_23 = arith.constant 0.00999999977 : f32
      %31 = vector.broadcast %cst_23 : f32 to vector<2x32xf32>
      %32 = arith.mulf %31, %28 : vector<2x32xf32>
      %33 = arith.select %30, %28, %32 : vector<2x32xi1>, vector<2x32xf32>
      %c0_24 = arith.constant 0 : index
      %c0_25 = arith.constant 0 : index
      %34 = vector.load %arg7[%c0_24, %c0_25] : memref<2x64xf32, #tpu.memory_space<vmem>>, vector<2x64xf32>
      %35 = arith.truncf %34 : vector<2x64xf32> to vector<2x64xbf16>
      %c0_26 = arith.constant 0 : index
      %c0_27 = arith.constant 0 : index
      %36 = vector.load %arg8[%c0_26, %c0_27] : memref<64x32xbf16, #tpu.memory_space<vmem>>, vector<64x32xbf16>
      %cst_28 = arith.constant dense<0.000000e+00> : vector<2x32xf32>
      %37 = tpu.matmul %35, %36, %cst_28 {dimension_numbers = #tpu.dot_dimension_numbers<[1], [0], [0], [1], [0, 0, 1, 1], [], []>} : vector<2x64xbf16>, vector<64x32xbf16>, vector<2x32xf32> -> vector<2x32xf32>
      %c0_29 = arith.constant 0 : index
      %c0_30 = arith.constant 0 : index
      %38 = vector.load %arg9[%c0_29, %c0_30] : memref<1x32xf32, #tpu.memory_space<vmem>>, vector<1x32xf32>
      %39 = vector.broadcast %38 : vector<1x32xf32> to vector<2x32xf32>
      %40 = arith.addf %37, %39 : vector<2x32xf32>
      %cst_31 = arith.constant 0.000000e+00 : f32
      %41 = vector.broadcast %cst_31 : f32 to vector<2x32xf32>
      %42 = arith.cmpf oge, %40, %41 : vector<2x32xf32>
      %cst_32 = arith.constant 1.000000e-01 : f32
      %43 = vector.broadcast %cst_32 : f32 to vector<2x32xf32>
      %44 = arith.mulf %43, %40 : vector<2x32xf32>
      %45 = arith.select %42, %40, %44 : vector<2x32xi1>, vector<2x32xf32>
      %c0_33 = arith.constant 0 : index
      %c0_34 = arith.constant 0 : index
      %46 = vector.load %arg10[%c0_33, %c0_34] : memref<2x64xf32, #tpu.memory_space<vmem>>, vector<2x64xf32>
      %47 = arith.truncf %46 : vector<2x64xf32> to vector<2x64xbf16>
      %c0_35 = arith.constant 0 : index
      %c0_36 = arith.constant 0 : index
      %48 = vector.load %arg11[%c0_35, %c0_36] : memref<64x32xbf16, #tpu.memory_space<vmem>>, vector<64x32xbf16>
      %cst_37 = arith.constant dense<0.000000e+00> : vector<2x32xf32>
      %49 = tpu.matmul %47, %48, %cst_37 {dimension_numbers = #tpu.dot_dimension_numbers<[1], [0], [0], [1], [0, 0, 1, 1], [], []>} : vector<2x64xbf16>, vector<64x32xbf16>, vector<2x32xf32> -> vector<2x32xf32>
      %c0_38 = arith.constant 0 : index
      %c0_39 = arith.constant 0 : index
      %50 = vector.load %arg12[%c0_38, %c0_39] : memref<1x32xf32, #tpu.memory_space<vmem>>, vector<1x32xf32>
      %51 = vector.broadcast %50 : vector<1x32xf32> to vector<2x32xf32>
      %52 = arith.addf %49, %51 : vector<2x32xf32>
      %cst_40 = arith.constant 0.000000e+00 : f32
      %53 = vector.broadcast %cst_40 : f32 to vector<2x32xf32>
      %54 = arith.cmpf oge, %52, %53 : vector<2x32xf32>
      %cst_41 = arith.constant 1.000000e-01 : f32
      %55 = vector.broadcast %cst_41 : f32 to vector<2x32xf32>
      %56 = arith.mulf %55, %52 : vector<2x32xf32>
      %57 = arith.select %54, %52, %56 : vector<2x32xi1>, vector<2x32xf32>
      %c0_42 = arith.constant 0 : index
      %c0_43 = arith.constant 0 : index
      %58 = vector.load %arg13[%c0_42, %c0_43] : memref<2x256xf32, #tpu.memory_space<vmem>>, vector<2x256xf32>
      %59 = arith.truncf %58 : vector<2x256xf32> to vector<2x256xbf16>
      %c0_44 = arith.constant 0 : index
      %c0_45 = arith.constant 0 : index
      %60 = vector.load %arg14[%c0_44, %c0_45] : memref<256x32xbf16, #tpu.memory_space<vmem>>, vector<256x32xbf16>
      %cst_46 = arith.constant dense<0.000000e+00> : vector<2x32xf32>
      %61 = tpu.matmul %59, %60, %cst_46 {dimension_numbers = #tpu.dot_dimension_numbers<[1], [0], [0], [1], [0, 0, 1, 1], [], []>} : vector<2x256xbf16>, vector<256x32xbf16>, vector<2x32xf32> -> vector<2x32xf32>
      %c0_47 = arith.constant 0 : index
      %c0_48 = arith.constant 0 : index
      %62 = vector.load %arg15[%c0_47, %c0_48] : memref<1x32xf32, #tpu.memory_space<vmem>>, vector<1x32xf32>
      %63 = vector.broadcast %62 : vector<1x32xf32> to vector<2x32xf32>
      %64 = arith.addf %61, %63 : vector<2x32xf32>
      %cst_49 = arith.constant 0.000000e+00 : f32
      %65 = vector.broadcast %cst_49 : f32 to vector<2x32xf32>
      %66 = arith.cmpf oge, %64, %65 : vector<2x32xf32>
      %cst_50 = arith.constant 1.000000e-01 : f32
      %67 = vector.broadcast %cst_50 : f32 to vector<2x32xf32>
      %68 = arith.mulf %67, %64 : vector<2x32xf32>
      %69 = arith.select %66, %64, %68 : vector<2x32xi1>, vector<2x32xf32>
      %c0_51 = arith.constant 0 : index
      %c0_52 = arith.constant 0 : index
      %70 = vector.load %arg16[%c0_51, %c0_52] : memref<1x32xf32, #tpu.memory_space<vmem>>, vector<1x32xf32>
      %71 = vector.broadcast %70 : vector<1x32xf32> to vector<2x32xf32>
      %72 = arith.mulf %21, %71 : vector<2x32xf32>
      %cst_53 = arith.constant dense<0.000000e+00> : vector<2xf32>
      %73 = vector.multi_reduction <add>, %72, %cst_53 [1] : vector<2x32xf32> to vector<2xf32>
      %74 = vector.shape_cast %73 : vector<2xf32> to vector<2x1xf32>
      %c0_54 = arith.constant 0 : index
      %c0_55 = arith.constant 0 : index
      %75 = vector.load %arg17[%c0_54, %c0_55] : memref<1x32xf32, #tpu.memory_space<vmem>>, vector<1x32xf32>
      %76 = vector.broadcast %75 : vector<1x32xf32> to vector<2x32xf32>
      %77 = arith.mulf %33, %76 : vector<2x32xf32>
      %cst_56 = arith.constant dense<0.000000e+00> : vector<2xf32>
      %78 = vector.multi_reduction <add>, %77, %cst_56 [1] : vector<2x32xf32> to vector<2xf32>
      %79 = vector.shape_cast %78 : vector<2xf32> to vector<2x1xf32>
      %80 = arith.addf %74, %79 : vector<2x1xf32>
      %c0_57 = arith.constant 0 : index
      %c0_58 = arith.constant 0 : index
      %81 = vector.load %arg18[%c0_57, %c0_58] : memref<1x32xf32, #tpu.memory_space<vmem>>, vector<1x32xf32>
      %82 = vector.broadcast %81 : vector<1x32xf32> to vector<2x32xf32>
      %83 = arith.mulf %45, %82 : vector<2x32xf32>
      %cst_59 = arith.constant dense<0.000000e+00> : vector<2xf32>
      %84 = vector.multi_reduction <add>, %83, %cst_59 [1] : vector<2x32xf32> to vector<2xf32>
      %85 = vector.shape_cast %84 : vector<2xf32> to vector<2x1xf32>
      %86 = arith.addf %80, %85 : vector<2x1xf32>
      %c0_60 = arith.constant 0 : index
      %c0_61 = arith.constant 0 : index
      %87 = vector.load %arg19[%c0_60, %c0_61] : memref<1x32xf32, #tpu.memory_space<vmem>>, vector<1x32xf32>
      %88 = vector.broadcast %87 : vector<1x32xf32> to vector<2x32xf32>
      %89 = arith.mulf %57, %88 : vector<2x32xf32>
      %cst_62 = arith.constant dense<0.000000e+00> : vector<2xf32>
      %90 = vector.multi_reduction <add>, %89, %cst_62 [1] : vector<2x32xf32> to vector<2xf32>
      %91 = vector.shape_cast %90 : vector<2xf32> to vector<2x1xf32>
      %92 = arith.addf %86, %91 : vector<2x1xf32>
      %c0_63 = arith.constant 0 : index
      %c0_64 = arith.constant 0 : index
      %93 = vector.load %arg20[%c0_63, %c0_64] : memref<1x32xf32, #tpu.memory_space<vmem>>, vector<1x32xf32>
      %94 = vector.broadcast %93 : vector<1x32xf32> to vector<2x32xf32>
      %95 = arith.mulf %69, %94 : vector<2x32xf32>
      %cst_65 = arith.constant dense<0.000000e+00> : vector<2xf32>
      %96 = vector.multi_reduction <add>, %95, %cst_65 [1] : vector<2x32xf32> to vector<2xf32>
      %97 = vector.shape_cast %96 : vector<2xf32> to vector<2x1xf32>
      %98 = arith.addf %92, %97 : vector<2x1xf32>
      %c0_66 = arith.constant 0 : index
      %c0_67 = arith.constant 0 : index
      %99 = vector.load %arg21[%c0_66, %c0_67] : memref<1x1xf32, #tpu.memory_space<vmem>>, vector<1x1xf32>
      %100 = vector.broadcast %99 : vector<1x1xf32> to vector<2x1xf32>
      %101 = arith.addf %98, %100 : vector<2x1xf32>
      %cst_68 = arith.constant 0.000000e+00 : f32
      %102 = vector.broadcast %cst_68 : f32 to vector<2x1xf32>
      %103 = arith.subf %102, %101 : vector<2x1xf32>
      %104 = math.exp %103 : vector<2x1xf32>
      %cst_69 = arith.constant 1.000000e+00 : f32
      %105 = vector.broadcast %cst_69 : f32 to vector<2x1xf32>
      %106 = arith.addf %105, %104 : vector<2x1xf32>
      %cst_70 = arith.constant 1.000000e+00 : f32
      %107 = vector.broadcast %cst_70 : f32 to vector<2x1xf32>
      %108 = arith.divf %107, %106 : vector<2x1xf32>
      %c0_71 = arith.constant 0 : index
      %c0_72 = arith.constant 0 : index
      %109 = vector.load %arg22[%c0_71, %c0_72] : memref<2x1xf32, #tpu.memory_space<vmem>>, vector<2x1xf32>
      tpu.vector_store %arg22[%c0_71, %c0_72], %108 {strides = array<i32>} : memref<2x1xf32, #tpu.memory_space<vmem>>, vector<2x1xf32>,
    } else {
    }
    return
  }
  func.func @transform_0(%arg0: i32) -> (i32, i32) {
    %c0_i32 = arith.constant 0 : i32
    %c0_i32_0 = arith.constant 0 : i32
    return %c0_i32, %arg0 : i32, i32
  }
  func.func @transform_1(%arg0: i32) -> (i32, i32) {
    %c0_i32 = arith.constant 0 : i32
    %c0_i32_0 = arith.constant 0 : i32
    return %arg0, %c0_i32 : i32, i32
  }
  func.func @transform_2(%arg0: i32) -> (i32, i32) {
    %c0_i32 = arith.constant 0 : i32
    %c0_i32_0 = arith.constant 0 : i32
    %c0_i32_1 = arith.constant 0 : i32
    return %c0_i32, %c0_i32_0 : i32, i32
  }
  func.func @transform_3(%arg0: i32) -> (i32, i32) {
    %c0_i32 = arith.constant 0 : i32
    %c0_i32_0 = arith.constant 0 : i32
    %c0_i32_1 = arith.constant 0 : i32
    return %c0_i32, %c0_i32_0 : i32, i32
  }
  func.func @transform_4(%arg0: i32) -> (i32, i32) {
    %c0_i32 = arith.constant 0 : i32
    %c0_i32_0 = arith.constant 0 : i32
    %c0_i32_1 = arith.constant 0 : i32
    return %c0_i32, %c0_i32_0 : i32, i32
  }
  func.func @transform_5(%arg0: i32) -> (i32, i32) {
    %c0_i32 = arith.constant 0 : i32
    %c0_i32_0 = arith.constant 0 : i32
    %c0_i32_1 = arith.constant 0 : i32
    return %c0_i32, %c0_i32_0 : i32, i32
  }
  func.func @transform_6(%arg0: i32) -> (i32, i32) {
    %c0_i32 = arith.constant 0 : i32
    %c0_i32_0 = arith.constant 0 : i32
    %c0_i32_1 = arith.constant 0 : i32
    return %c0_i32, %c0_i32_0 : i32, i32
  }
  func.func @transform_7(%arg0: i32) -> (i32, i32) {
    %c0_i32 = arith.constant 0 : i32
    %c0_i32_0 = arith.constant 0 : i32
    %c0_i32_1 = arith.constant 0 : i32
    return %c0_i32, %c0_i32_0 : i32, i32
  }
  func.func @transform_8(%arg0: i32) -> (i32, i32) {
    %c0_i32 = arith.constant 0 : i32
    %c0_i32_0 = arith.constant 0 : i32
    %c0_i32_1 = arith.constant 0 : i32
    return %c0_i32, %c0_i32_0 : i32, i32
  }
  func.func @transform_9(%arg0: i32) -> (i32, i32) {
    %c0_i32 = arith.constant 0 : i32
    %c0_i32_0 = arith.constant 0 : i32
    %c0_i32_1 = arith.constant 0 : i32
    return %c0_i32, %c0_i32_0 : i32, i32
  }
  func.func @transform_10(%arg0: i32) -> (i32, i32) {
    %c0_i32 = arith.constant 0 : i32
    %c0_i32_0 = arith.constant 0 : i32
    %c0_i32_1 = arith.constant 0 : i32
    return %c0_i32, %c0_i32_0 : i32, i32
  }
  func.func @transform_11(%arg0: i32) -> (i32, i32) {
    %c0_i32 = arith.constant 0 : i32
    %c0_i32_0 = arith.constant 0 : i32
    %c0_i32_1 = arith.constant 0 : i32
    return %c0_i32, %c0_i32_0 : i32, i32
  }
  func.func @transform_12(%arg0: i32) -> (i32, i32) {
    %c0_i32 = arith.constant 0 : i32
    %c0_i32_0 = arith.constant 0 : i32
    %c0_i32_1 = arith.constant 0 : i32
    return %c0_i32, %c0_i32_0 : i32, i32
  }
  func.func @transform_13(%arg0: i32) -> (i32, i32) {
    %c0_i32 = arith.constant 0 : i32
    %c0_i32_0 = arith.constant 0 : i32
    %c0_i32_1 = arith.constant 0 : i32
    return %c0_i32, %c0_i32_0 : i32, i32
  }
  func.func @transform_14(%arg0: i32) -> (i32, i32) {
    %c0_i32 = arith.constant 0 : i32
    %c0_i32_0 = arith.constant 0 : i32
    %c0_i32_1 = arith.constant 0 : i32
    return %c0_i32, %c0_i32_0 : i32, i32
  }
  func.func @transform_15(%arg0: i32) -> (i32, i32) {
    %c0_i32 = arith.constant 0 : i32
    %c0_i32_0 = arith.constant 0 : i32
    %c0_i32_1 = arith.constant 0 : i32
    return %c0_i32, %c0_i32_0 : i32, i32
  }
  func.func @transform_16(%arg0: i32) -> (i32, i32) {
    %c0_i32 = arith.constant 0 : i32
    %c0_i32_0 = arith.constant 0 : i32
    %c0_i32_1 = arith.constant 0 : i32
    return %c0_i32, %c0_i32_0 : i32, i32
  }
  func.func @transform_17(%arg0: i32) -> (i32, i32) {
    %c0_i32 = arith.constant 0 : i32
    %c0_i32_0 = arith.constant 0 : i32
    %c0_i32_1 = arith.constant 0 : i32
    return %c0_i32, %c0_i32_0 : i32, i32
  }
  func.func @transform_18(%arg0: i32) -> (i32, i32) {
    %c0_i32 = arith.constant 0 : i32
    %c0_i32_0 = arith.constant 0 : i32
    %c0_i32_1 = arith.constant 0 : i32
    return %c0_i32, %c0_i32_0 : i32, i32
  }
  func.func @transform_19(%arg0: i32) -> (i32, i32) {
    %c0_i32 = arith.constant 0 : i32
    %c0_i32_0 = arith.constant 0 : i32
    %c0_i32_1 = arith.constant 0 : i32
    return %c0_i32, %c0_i32_0 : i32, i32
  }
  func.func @transform_20(%arg0: i32) -> (i32, i32) {
    %c0_i32 = arith.constant 0 : i32
    %c0_i32_0 = arith.constant 0 : i32
    %c0_i32_1 = arith.constant 0 : i32
    return %c0_i32, %c0_i32_0 : i32, i32
  }
  func.func @transform_21(%arg0: i32) -> (i32, i32) {
    %c0_i32 = arith.constant 0 : i32
    %c0_i32_0 = arith.constant 0 : i32
    %c0_i32_1 = arith.constant 0 : i32
    return %c0_i32, %c0_i32_0 : i32, i32
  }
}

</mosaic_0001>

<bundles_post_ra>
// kernel: forward.2
= control target key start
LH: loop header
LB: loop body
LE: loop exit
PB: predicated region body
PF: predicated region fallthrough
CT: control target
= control target key end

     0   :  { %v307_v0 = vmov 0.0   ;;  %vm308_vm0 = vmmov 0   ;;  %vm194_vm1 = vcmask 523264   ;;  %vm207_vm2 = vcmask 517120   ;;  %s476_s1 = inlined_call_operand.vmem [shape: bf16[128,64], index: 1, kind: input, shape index: {}]   ;;  %s477_s0 = inlined_call_operand.vmem [shape: f32[98,128], index: 0, kind: input, shape index: {}]   ;;  %s478_s2 = inlined_call_operand.vmem [shape: f32[1,64], index: 2, kind: input, shape index: {}]   ;;  %s479_s3 = inlined_call_operand.vmem [shape: f32[98,64], index: 3, kind: output, shape index: {}]  }
   0x1   :  { %237 = vmatprep.subr.bf16.mxu0 %v307_v0  ;;  %v299_v1 = vld [vmem:[%s476_s1] sm:$0xff]   ;;  %281 = vmatprep.subr.bf16.mxu1 %v307_v0  ;;  %v300_v2 = vld [vmem:[%s476_s1 + $0x8] sm:$0xff]   ;;  %v301_v3 = vld [vmem:[%s476_s1 + $0x10] sm:$0xff]  }
   0x2   :  { %253 = vmatprep.mubr.msk.bf16.mxu0 %vm308_vm0, %v307_v0  ;;  %269 = vmatprep.mubr.msk.bf16.mxu1 %vm308_vm0, %v307_v0  ;;  %v302_v4 = vld [vmem:[%s476_s1 + $0x18] sm:$0xff]   ;;  %v303_v5 = vld [vmem:[%s476_s1 + $0x20] sm:$0xff]   ;;  %v304_v6 = vld [vmem:[%s476_s1 + $0x28] sm:$0xff]  }
   0x3   :  { %238 = vmatpush3.bf16.msra.mxu0 %v299_v1  ;;  %289 = vmatpush3.bf16.msra.mxu1 %v299_v1  ;;  %v305_v7 = vld [vmem:[%s476_s1 + $0x30] sm:$0xff]   ;;  %v306_v8 = vld [vmem:[%s476_s1 + $0x38] sm:$0xff]   ;;  %v15_v9 = vld [vmem:[%s477_s0] sm:$0xff] }
   0x4   :  { %239 = vmatprep.subr.bf16.mxu0 %v307_v0  ;;  %282 = vmatprep.subr.bf16.mxu1 %v307_v0  ;;  %v16_v10 = vld [vmem:[%s477_s0 + $0x8] sm:$0xff]  ;;  %v23_v11 = vld [vmem:[%s477_s0 + $0x40] sm:$0xff]  ;;  %v17_v15 = vld [vmem:[%s477_s0 + $0x10] sm:$0xff] }
   0x5   :  { %v24_v12 = vld [vmem:[%s477_s0 + $0x48] sm:$0xff]  ;;  %v28_v13 = vpack.c.bf16 %v16_v10, %v15_v9  ;;  %v18_v16 = vld [vmem:[%s477_s0 + $0x18] sm:$0xff]  ;;  %v25_v17 = vld [vmem:[%s477_s0 + $0x50] sm:$0xff] }
   0x6   :  { %v32_v14 = vpack.c.bf16 %v24_v12, %v23_v11  ;;  %v26_v18 = vld [vmem:[%s477_s0 + $0x58] sm:$0xff]  ;;  %v29_v19 = vpack.c.bf16 %v18_v16, %v17_v15  ;;  %v19_v21 = vld [vmem:[%s477_s0 + $0x20] sm:$0xff]  ;;  %v20_v22 = vld [vmem:[%s477_s0 + $0x28] sm:$0xff] }
   0x7   :  { %240 = vmatpush3.bf16.msra.mxu0 %v300_v2  ;;  %290 = vmatpush3.bf16.msra.mxu1 %v300_v2  ;;  %v33_v20 = vpack.c.bf16 %v26_v18, %v25_v17  ;;  %v27_v23 = vld [vmem:[%s477_s0 + $0x60] sm:$0x3]  ;;  %v30_v24 = vpack.c.bf16 %v20_v22, %v19_v21  ;;  %v21_v26 = vld [vmem:[%s477_s0 + $0x30] sm:$0xff]  ;;  %v22_v27 = vld [vmem:[%s477_s0 + $0x38] sm:$0xff] }
   0x8   :  { %241 = vmatprep.subr.bf16.mxu0 %v307_v0  ;;  %283 = vmatprep.subr.bf16.mxu1 %v307_v0  ;;  %v34_v25 = vpack.c.bf16 %v27_v23, %v27_v23  ;;  %v31_v28 = vpack.c.bf16 %v22_v27, %v21_v26  ;;  %v213_v29 = vld [vmem:[%s478_s2] ss:$0 sm:$0xff] }
   0xb   :  { %242 = vmatpush3.bf16.msra.mxu0 %v301_v3  ;;  %291 = vmatpush3.bf16.msra.mxu1 %v301_v3 }
   0xc   :  { %243 = vmatprep.subr.bf16.mxu0 %v307_v0  ;;  %284 = vmatprep.subr.bf16.mxu1 %v307_v0 }
   0xf   :  { %244 = vmatpush3.bf16.msra.mxu0 %v302_v4  ;;  %292 = vmatpush3.bf16.msra.mxu1 %v302_v4 }
  0x10   :  { %245 = vmatprep.subr.bf16.mxu0 %v307_v0  ;;  %285 = vmatprep.subr.bf16.mxu1 %v307_v0 }
  0x13   :  { %246 = vmatpush3.bf16.msra.mxu0 %v303_v5  ;;  %293 = vmatpush3.bf16.msra.mxu1 %v303_v5 }
  0x14   :  { %247 = vmatprep.subr.bf16.mxu0 %v307_v0  ;;  %286 = vmatprep.subr.bf16.mxu1 %v307_v0 }
  0x17   :  { %248 = vmatpush3.bf16.msra.mxu0 %v304_v6  ;;  %294 = vmatpush3.bf16.msra.mxu1 %v304_v6 }
  0x18   :  { %249 = vmatprep.subr.bf16.mxu0 %v307_v0  ;;  %287 = vmatprep.subr.bf16.mxu1 %v307_v0 }
  0x1b   :  { %250 = vmatpush3.bf16.msra.mxu0 %v305_v7  ;;  %295 = vmatpush3.bf16.msra.mxu1 %v305_v7 }
  0x1c   :  { %251 = vmatprep.subr.bf16.mxu0 %v307_v0  ;;  %288 = vmatprep.subr.bf16.mxu1 %v307_v0 }
  0x1f   :  { %252 = vmatpush3.bf16.msra.mxu0 %v306_v8  ;;  %296 = vmatpush3.bf16.msra.mxu1 %v306_v8 }
  0x22   :  { %254 = vmatmul.mubr.bf16.vlgmr.msra.gmra.mrb[0].mxu0 %v28_v13  ;;  %270 = vmatmul.mubr.bf16.vlgmr.msra.gmra.mrb[0].mxu1 %v32_v14 }
  0x23   :  { %257 = vmatprep.mubr.msk.bf16.mxu0 %vm308_vm0, %v307_v0  ;;  %273 = vmatprep.mubr.msk.bf16.mxu1 %vm308_vm0, %v307_v0 }
  0x2a   :  { %258 = vmatmul.mubr.bf16.gmra.mrb[4].mxu0 %v29_v19  ;;  %274 = vmatmul.mubr.bf16.gmra.mrb[4].mxu1 %v33_v20 }
  0x2b   :  { %261 = vmatprep.mubr.msk.bf16.mxu0 %vm308_vm0, %v307_v0  ;;  %277 = vmatprep.mubr.msk.bf16.mxu1 %vm308_vm0, %v307_v0 }
  0x32   :  { %262 = vmatmul.mubr.bf16.gmra.mrb[8].mxu0 %v30_v24  ;;  %278 = vmatmul.mubr.bf16.gmra.mrb[8].mxu1 %v34_v25 }
  0x33   :  { %265 = vmatprep.mubr.msk.bf16.mxu0 %vm308_vm0, %v307_v0 }
  0x3a   :  { %266 = vmatmul.mubr.bf16.gmra.mrb[12].mxu0 %v31_v28 }
  0xf5   :  { %v140_v30 = vpop.f32.mrb[0].mxu0  ;;  %v172_v31 = vpop.f32.mrb[0].mxu1 }
  0xf6   :  { %v141_v32 = vadd.f32 %v213_v29, %v140_v30  ;;  %v255_v33 = vpop.f32.mrb[1].mxu0  ;;  %v173_v34 = vadd.f32 %v213_v29, %v172_v31  ;;  %v271_v35 = vpop.f32.mrb[1].mxu1 }
  0xf7   :  { %v143_v36 = vpop.f32.mrb[2].mxu0  ;;  %v175_v37 = vpop.f32.mrb[2].mxu1 }
  0xf8   :  { %195 = vst.msk [vmem:[%s479_s3] sm:$0xff] %vm194_vm1, %v141_v32  ;;  %v144_v38 = vadd.f32 %v213_v29, %v143_v36  ;;  %v256_v39 = vpop.f32.mrb[3].mxu0  ;;  %203 = vst.msk [vmem:[%s479_s3 + $0x40] sm:$0xff] %vm194_vm1, %v173_v34  ;;  %v176_v40 = vadd.f32 %v213_v29, %v175_v37  ;;  %v272_v41 = vpop.f32.mrb[3].mxu1 }
  0xfa   :  { %196 = vst.msk [vmem:[%s479_s3 + $0x8] sm:$0xff] %vm194_vm1, %v144_v38  ;;  %204 = vst.msk [vmem:[%s479_s3 + $0x48] sm:$0xff] %vm194_vm1, %v176_v40 }
  0xfd   :  { %v148_v42 = vpop.f32.mrb[4].mxu0  ;;  %v180_v43 = vpop.f32.mrb[4].mxu1 }
  0xfe   :  { %v149_v44 = vadd.f32 %v213_v29, %v148_v42  ;;  %v259_v45 = vpop.f32.mrb[5].mxu0  ;;  %v181_v46 = vadd.f32 %v213_v29, %v180_v43  ;;  %v275_v47 = vpop.f32.mrb[5].mxu1 }
  0xff   :  { %v151_v48 = vpop.f32.mrb[6].mxu0  ;;  %v183_v49 = vpop.f32.mrb[6].mxu1 }
 0x100   :  { %197 = vst.msk [vmem:[%s479_s3 + $0x10] sm:$0xff] %vm194_vm1, %v149_v44  ;;  %v152_v50 = vadd.f32 %v213_v29, %v151_v48  ;;  %v260_v51 = vpop.f32.mrb[7].mxu0  ;;  %205 = vst.msk [vmem:[%s479_s3 + $0x50] sm:$0xff] %vm194_vm1, %v181_v46  ;;  %v184_v52 = vadd.f32 %v213_v29, %v183_v49  ;;  %v276_v53 = vpop.f32.mrb[7].mxu1 }
 0x102   :  { %198 = vst.msk [vmem:[%s479_s3 + $0x18] sm:$0xff] %vm194_vm1, %v152_v50  ;;  %206 = vst.msk [vmem:[%s479_s3 + $0x58] sm:$0xff] %vm194_vm1, %v184_v52 }
 0x105   :  { %v156_v54 = vpop.f32.mrb[8].mxu0  ;;  %v188_v55 = vpop.f32.mrb[8].mxu1 }
 0x106   :  { %v157_v56 = vadd.f32 %v213_v29, %v156_v54  ;;  %v263_v57 = vpop.f32.mrb[9].mxu0  ;;  %v189_v58 = vadd.f32 %v213_v29, %v188_v55  ;;  %v279_v59 = vpop.f32.mrb[9].mxu1 }
 0x107   :  { %v159_v60 = vpop.f32.mrb[10].mxu0  ;;  %v191_v61 = vpop.f32.mrb[10].mxu1 }
 0x108   :  { %199 = vst.msk [vmem:[%s479_s3 + $0x20] sm:$0xff] %vm194_vm1, %v157_v56  ;;  %v160_v62 = vadd.f32 %v213_v29, %v159_v60  ;;  %v264_v63 = vpop.f32.mrb[11].mxu0  ;;  %v280_v0 = vpop.f32.mrb[11].mxu1 }
 0x109   :  { %208 = vst.msk [vmem:[%s479_s3 + $0x60] sm:$0x3] %vm207_vm2, %v189_v58 }
 0x10a   :  { %200 = vst.msk [vmem:[%s479_s3 + $0x28] sm:$0xff] %vm194_vm1, %v160_v62 }
 0x10d   :  { %v164_v1 = vpop.f32.mrb[12].mxu0 }
 0x10e   :  { %v165_v2 = vadd.f32 %v213_v29, %v164_v1  ;;  %v267_v3 = vpop.f32.mrb[13].mxu0 }
 0x10f   :  { %v167_v4 = vpop.f32.mrb[14].mxu0 }
 0x110   :  { %201 = vst.msk [vmem:[%s479_s3 + $0x30] sm:$0xff] %vm194_vm1, %v165_v2  ;;  %v168_v5 = vadd.f32 %v213_v29, %v167_v4  ;;  %v268_v6 = vpop.f32.mrb[15].mxu0 }
 0x112   :  { %202 = vst.msk [vmem:[%s479_s3 + $0x38] sm:$0xff] %vm194_vm1, %v168_v5 }

// kernel: forward.3
= control target key start
LH: loop header
LB: loop body
LE: loop exit
PB: predicated region body
PF: predicated region fallthrough
CT: control target
= control target key end

     0   :  { %s4875_s26 = smov 0   ;;  %s5701_s0 = inlined_call_operand.vmem [shape: f32[2,1536], index: 0, kind: input, shape index: {}]   ;;  %s5702_s1 = inlined_call_operand.vmem [shape: bf16[1536,32], index: 1, kind: input, shape index: {}]   ;;  %s5703_s2 = inlined_call_operand.vmem [shape: f32[1,32], index: 2, kind: input, shape index: {}]   ;;  %s5704_s3 = inlined_call_operand.vmem [shape: f32[2,3136], index: 3, kind: input, shape index: {}]   ;;  %s5705_s4 = inlined_call_operand.vmem [shape: bf16[3136,32], index: 4, kind: input, shape index: {}]   ;;  %s5706_s5 = inlined_call_operand.vmem [shape: f32[1,32], index: 5, kind: input, shape index: {}]   ;;  %s5707_s6 = inlined_call_operand.vmem [shape: f32[2,64], index: 6, kind: input, shape index: {}]   ;;  %s5708_s7 = inlined_call_operand.vmem [shape: bf16[64,32], index: 7, kind: input, shape index: {}]   ;;  %s5709_s8 = inlined_call_operand.vmem [shape: f32[1,32], index: 8, kind: input, shape index: {}]   ;;  %s5710_s9 = inlined_call_operand.vmem [shape: f32[2,64], index: 9, kind: input, shape index: {}]   ;;  %s5711_s10 = inlined_call_operand.vmem [shape: bf16[64,32], index: 10, kind: input, shape index: {}]   ;;  %s5712_s11 = inlined_call_operand.vmem [shape: f32[1,32], index: 11, kind: input, shape index: {}]   ;;  %s5713_s12 = inlined_call_operand.vmem [shape: f32[2,256], index: 12, kind: input, shape index: {}]   ;;  %s5714_s13 = inlined_call_operand.vmem [shape: bf16[256,32], index: 13, kind: input, shape index: {}]   ;;  %s5715_s14 = inlined_call_operand.vmem [shape: f32[1,32], index: 14, kind: input, shape index: {}]   ;;  %s5716_s15 = inlined_call_operand.vmem [shape: f32[1,32], index: 15, kind: input, shape index: {}]   ;;  %s5717_s16 = inlined_call_operand.vmem [shape: f32[1,32], index: 16, kind: input, shape index: {}]   ;;  %s5718_s17 = inlined_call_operand.vmem [shape: f32[1,32], index: 17, kind: input, shape index: {}]   ;;  %s5719_s18 = inlined_call_operand.vmem [shape: f32[1,32], index: 18, kind: input, shape index: {}]   ;;  %s5720_s19 = inlined_call_operand.vmem [shape: f32[1,32], index: 19, kind: input, shape index: {}]   ;;  %s5721_s20 = inlined_call_operand.<no memory space> [shape: f32[1,1], index: 20, kind: input, shape index: {}]   ;;  %s5722_s21 = inlined_call_operand.vmem [shape: f32[2,1], index: 21, kind: output, shape index: {}]  }
   0x1   :  { %5725 = sst [smem:[#allocation4_spill]] %s5701_s0  ;;  %v26_v0 = vstv %s5721_s20 }
   0x2   :  { %5726 = sst [smem:[#allocation5_spill]] %s5702_s1  ;;  %27 = vst [vmem:[#allocation3] sm:$0x1] %v26_v0 }
   0x3   :  { %5727 = sst [smem:[#allocation6_spill]] %s5703_s2 }
   0x4   :  { %5728 = sst [smem:[#allocation7_spill]] %s5704_s3 }
   0x5   :  { %5729 = sst [smem:[#allocation8_spill]] %s5705_s4 }
   0x6   :  { %5730 = sst [smem:[#allocation9_spill]] %s5706_s5 }
   0x7 LB: > { %s4881_s27 = sadd.s32 4294967295, %s4756_s26   ;;  %p3817_p0 = scmp.ge.s32.totalorder %s4756_s26, 1  ;;  %s4756_s26 = sphi %s4875_s26, %s33_s26  }
   0x8   : > { %p596_p1 = scmp.lt.s32.totalorder %s4756_s26, 4 }
   0xa   : > { %p597_p2 = pnand %p3817_p0, %p596_p1 }
   0xb   : > { %s3818_s20 = sshll.u32 (!%p597_p2), %s4881_s27, 2  ;;  %s3820_s3 = sshll.u32 (!%p597_p2), %s4881_s27, 6 }
   0xc   : > { %600 = sbr.rel (%p597_p2) target bundleno = 885 (0x375), region = 104  ;;  %p657_p3 = scmp.lt.s32.totalorder (!%p597_p2), %s3818_s20, 11 }
   0xd   : > { %p663_p4 = scmp.lt.s32.totalorder (!%p597_p2), %s3820_s3, 191  ;;  %s5731_s4 = sld [smem:[#allocation4_spill]] (!%p597_p2) }
   0xe   : > { %s5732_s1 = sld [smem:[#allocation5_spill]] (!%p597_p2)  ;;  %p3822_p5 = scmp.ne.s32.totalorder (!%p597_p2), %s4881_s27, 0 }
  0x13   : > { %s5738_s20 = smov (!%p657_p3, %s3818_s20), 11  ;;  %s5740_s3 = smov (!%p663_p4, %s3820_s3), 191 }
  0x14   : > { %s3819_s28 = sshll.u32 %s5738_s20, 1  ;;  %s3821_s5 = sshll.u32 %s5740_s3, 2  ;;  %vm673_vm0 = vcmask (!%p3822_p5), 254976   ;;  %v4758_v1 = vmov (!%p3822_p5), 0.0  }
  0x15   : > { %s4890_s30 = scalar_lea.vmem %s5731_s4, %s3819_s28  ;;  %s4895_s24 = scalar_lea.vmem %s5732_s1, %s3821_s5  ;;  %674 = vst.msk [vmem:[#allocation2] sm:$0x3] (!%p3822_p5), %vm673_vm0, %v4758_v1 }
  0x16   : > { %672 = sbr.rel (%p3822_p5) target bundleno = 29 (0x1d), region = 108 }
  0x1d PF: > { %v4487_v2 = vld [vmem:[%s4895_s24 + $0x40] sm:$0xff]   ;;  %v4491_v6 = vld [vmem:[%s4895_s24 + $0x48] sm:$0xff]   ;;  %v4495_v10 = vld [vmem:[%s4895_s24 + $0x50] sm:$0xff]   ;;  %v682_v32 = vlaneseq  ;;  %v4759_v36 = vmov 1983009808   ;;  %vm1040_vm1 = vcmask 254976  }
  0x1e   : > { %v4488_v3 = vld [vmem:[%s4895_s24 + $0xc0] sm:$0xff]   ;;  %4094 = vmatprep.subr.bf16.mxu0 %v4487_v2  ;;  %v4492_v7 = vld [vmem:[%s4895_s24 + $0xc8] sm:$0xff]   ;;  %v4496_v11 = vld [vmem:[%s4895_s24 + $0xd0] sm:$0xff]   ;;  %v680_v37 = vunpack.c.l.s4 %v4759_v36  ;;  %p3855_p6 = scmp.ne.s32.totalorder %s4881_s27, 2 }
  0x1f   : > { %v4489_v4 = vld [vmem:[%s4895_s24] sm:$0xff]   ;;  %4116 = vmatprep.subr.bf16.mxu1 %v4488_v3  ;;  %v4493_v8 = vld [vmem:[%s4895_s24 + $0x8] sm:$0xff]   ;;  %v4497_v12 = vld [vmem:[%s4895_s24 + $0x10] sm:$0xff]   ;;  %v683_v38 = vshrl.u32 %v682_v32, 7  ;;  %s5733_s20 = sld [smem:[#allocation8_spill]] (!%p3855_p6)  ;;  %s5734_s22 = sld [smem:[#allocation7_spill]] (!%p3855_p6) }
  0x20   : > { %v4490_v5 = vld [vmem:[%s4895_s24 + $0x80] sm:$0xff]   ;;  %4095 = vmatpush3.bf16.msra.mxu0 %v4489_v4  ;;  %v4494_v9 = vld [vmem:[%s4895_s24 + $0x88] sm:$0xff]   ;;  %v4498_v13 = vld [vmem:[%s4895_s24 + $0x90] sm:$0xff]   ;;  %v681_v39 = vunpack.c.0.s8 %v680_v37  ;;  %vm4761_vm2 = vmmov (!%p3855_p6), 0   ;;  %vm2806_vm3 = vcmask (!%p3855_p6), 523264   ;;  %s5735_s28 = sld [smem:[#allocation9_spill]] (!%p3855_p6) }
  0x21   : > { %4117 = vmatpush3.bf16.msra.mxu1 %v4490_v5  ;;  %4096 = vmatprep.subr.bf16.mxu0 %v4491_v6  ;;  %v4499_v14 = vld [vmem:[%s4895_s24 + $0x58] sm:$0xff]   ;;  %v4503_v18 = vld [vmem:[%s4895_s24 + $0x60] sm:$0xff]   ;;  %v4507_v22 = vld [vmem:[%s4895_s24 + $0x68] sm:$0xff]   ;;  %s5736_s4 = sld [smem:[#allocation6_spill]] (!%p3855_p6)  ;;  %vm3772_vm9 = vcmask (!%p3855_p6), 1024  }
  0x22   : > { %4118 = vmatprep.subr.bf16.mxu1 %v4492_v7  ;;  %v4500_v15 = vld [vmem:[%s4895_s24 + $0xd8] sm:$0xff]   ;;  %v4504_v19 = vld [vmem:[%s4895_s24 + $0xe0] sm:$0xff]   ;;  %v4508_v23 = vld [vmem:[%s4895_s24 + $0xe8] sm:$0xff]   ;;  %v4931_v41 = vsub.s32 %v681_v39, %v683_v38 }
  0x23   : > { %v4501_v16 = vld [vmem:[%s4895_s24 + $0x18] sm:$0xff]   ;;  %v4505_v20 = vld [vmem:[%s4895_s24 + $0x20] sm:$0xff]   ;;  %v4509_v24 = vld [vmem:[%s4895_s24 + $0x28] sm:$0xff]  }
  0x24   : > { %4097 = vmatpush3.bf16.msra.mxu0 %v4493_v8  ;;  %v4502_v17 = vld [vmem:[%s4895_s24 + $0x98] sm:$0xff]   ;;  %v4506_v21 = vld [vmem:[%s4895_s24 + $0xa0] sm:$0xff]   ;;  %v4510_v25 = vld [vmem:[%s4895_s24 + $0xa8] sm:$0xff]  }
  0x25   : > { %4119 = vmatpush3.bf16.msra.mxu1 %v4494_v9  ;;  %4098 = vmatprep.subr.bf16.mxu0 %v4495_v10  ;;  %v4511_v26 = vld [vmem:[%s4895_s24 + $0x70] sm:$0xff]   ;;  %v4515_v30 = vld [vmem:[%s4895_s24 + $0x78] sm:$0xff]   ;;  %v676_v35 = vld [vmem:[%s4890_s30] sm:$0xff] }
  0x26   : > { %4120 = vmatprep.subr.bf16.mxu1 %v4496_v11  ;;  %v4512_v27 = vld [vmem:[%s4895_s24 + $0xf0] sm:$0xff]   ;;  %v4516_v31 = vld [vmem:[%s4895_s24 + $0xf8] sm:$0xff]   ;;  %v678_v40 = vcombine.high %v676_v35, %v676_v35  ;;  %v685_v42 = vrot.slane %v676_v35, %v4931_v41  ;;  %v675_v58 = vld [vmem:[#allocation2] sm:$0x3] }
  0x27   : > { %v4513_v28 = vld [vmem:[%s4895_s24 + $0x30] sm:$0xff]   ;;  %v4517_v33 = vld [vmem:[%s4895_s24 + $0x38] sm:$0xff]   ;;  %v4520_v63 = vld [vmem:[%s5733_s20 + $0x40] sm:$0xff] (!%p3855_p6)  }
  0x28   : > { %4099 = vmatpush3.bf16.msra.mxu0 %v4497_v12  ;;  %v4514_v29 = vld [vmem:[%s4895_s24 + $0xb0] sm:$0xff]   ;;  %v4518_v34 = vld [vmem:[%s4895_s24 + $0xb8] sm:$0xff]   ;;  %v692_v43 = vrot.slane %v678_v40, %v4931_v41  ;;  %v693_v44 = vcombine.high %v685_v42, %v685_v42  ;;  %v699_v46 = vpack.c.bf16 %v685_v42, %v685_v42  ;;  %v4521_v0 = vld [vmem:[%s5733_s20 + $0xc0] sm:$0xff] (!%p3855_p6)  }
  0x29   : > { %4121 = vmatpush3.bf16.msra.mxu1 %v4498_v13  ;;  %4100 = vmatprep.subr.bf16.mxu0 %v4499_v14  ;;  %v4522_v1 = vld [vmem:[%s5733_s20] sm:$0xff] (!%p3855_p6)   ;;  %v4524_v3 = vld [vmem:[%s5733_s20 + $0x48] sm:$0xff] (!%p3855_p6)   ;;  %v4528_v7 = vld [vmem:[%s5733_s20 + $0x50] sm:$0xff] (!%p3855_p6)  }
  0x2a   : > { %4122 = vmatprep.subr.bf16.mxu1 %v4500_v15  ;;  %v694_v45 = vcombine.high %v692_v43, %v692_v43  ;;  %v701_v47 = vpack.c.bf16 %v692_v43, %v692_v43  ;;  %v700_v48 = vpack.c.bf16 %v693_v44, %v693_v44  ;;  %v4523_v2 = vld [vmem:[%s5733_s20 + $0x80] sm:$0xff] (!%p3855_p6)   ;;  %v4525_v4 = vld [vmem:[%s5733_s20 + $0xc8] sm:$0xff] (!%p3855_p6)   ;;  %v4529_v8 = vld [vmem:[%s5733_s20 + $0xd0] sm:$0xff] (!%p3855_p6)  }
  0x2b   : > { %v4526_v5 = vld [vmem:[%s5733_s20 + $0x8] sm:$0xff] (!%p3855_p6)   ;;  %v4530_v9 = vld [vmem:[%s5733_s20 + $0x10] sm:$0xff] (!%p3855_p6)   ;;  %v4532_v11 = vld [vmem:[%s5733_s20 + $0x58] sm:$0xff] (!%p3855_p6)  }
  0x2c   : > { %4101 = vmatpush3.bf16.msra.mxu0 %v4501_v16  ;;  %v702_v49 = vpack.c.bf16 %v694_v45, %v694_v45  ;;  %991 = vmatprep.mubr.bf16.mxu0 %v700_v48  ;;  %v4527_v6 = vld [vmem:[%s5733_s20 + $0x88] sm:$0xff] (!%p3855_p6)   ;;  %v4531_v10 = vld [vmem:[%s5733_s20 + $0x90] sm:$0xff] (!%p3855_p6)   ;;  %v4533_v12 = vld [vmem:[%s5733_s20 + $0xd8] sm:$0xff] (!%p3855_p6)  }
  0x2d   : > { %4123 = vmatpush3.bf16.msra.mxu1 %v4502_v17  ;;  %4102 = vmatprep.subr.bf16.mxu0 %v4503_v18  ;;  %v4534_v13 = vld [vmem:[%s5733_s20 + $0x18] sm:$0xff] (!%p3855_p6)   ;;  %v4536_v15 = vld [vmem:[%s5733_s20 + $0x60] sm:$0xff] (!%p3855_p6)   ;;  %v4557_v45 = vld [vmem:[%s5733_s20 + $0x148] sm:$0xff] (!%p3855_p6)  }
  0x2e   : > { %4124 = vmatprep.subr.bf16.mxu1 %v4504_v19  ;;  %1031 = vmatprep.mubr.bf16.mxu1 %v702_v49  ;;  %v4535_v14 = vld [vmem:[%s5733_s20 + $0x98] sm:$0xff] (!%p3855_p6)   ;;  %v4537_v16 = vld [vmem:[%s5733_s20 + $0xe0] sm:$0xff] (!%p3855_p6)   ;;  %v4540_v19 = vld [vmem:[%s5733_s20 + $0x68] sm:$0xff] (!%p3855_p6)  }
  0x2f   : > { %v4538_v17 = vld [vmem:[%s5733_s20 + $0x20] sm:$0xff] (!%p3855_p6)   ;;  %v4559_v48 = vld [vmem:[%s5733_s20 + $0x108] sm:$0xff] (!%p3855_p6)  }
  0x30   : > { %4103 = vmatpush3.bf16.msra.mxu0 %v4505_v20  ;;  %v4539_v18 = vld [vmem:[%s5733_s20 + $0xa0] sm:$0xff] (!%p3855_p6)   ;;  %v4541_v20 = vld [vmem:[%s5733_s20 + $0xe8] sm:$0xff] (!%p3855_p6)  }
  0x31   : > { %4125 = vmatpush3.bf16.msra.mxu1 %v4506_v21  ;;  %4104 = vmatprep.subr.bf16.mxu0 %v4507_v22  ;;  %v4542_v21 = vld [vmem:[%s5733_s20 + $0x28] sm:$0xff] (!%p3855_p6)   ;;  %v4554_v35 = vld [vmem:[%s5733_s20 + $0x1c0] sm:$0xff] (!%p3855_p6)  }
  0x32   : > { %4126 = vmatprep.subr.bf16.mxu1 %v4508_v23  ;;  %v4543_v22 = vld [vmem:[%s5733_s20 + $0xa8] sm:$0xff] (!%p3855_p6)   ;;  %v4544_v23 = vld [vmem:[%s5733_s20 + $0x70] sm:$0xff] (!%p3855_p6)   ;;  %v4555_v39 = vld [vmem:[%s5733_s20 + $0x100] sm:$0xff] (!%p3855_p6)  }
  0x33   : > { %v4556_v43 = vld [vmem:[%s5733_s20 + $0x180] sm:$0xff] (!%p3855_p6)   ;;  %v4560_v49 = vld [vmem:[%s5733_s20 + $0x188] sm:$0xff] (!%p3855_p6)  }
  0x34   : > { %4105 = vmatpush3.bf16.msra.mxu0 %v4509_v24  ;;  %v4545_v24 = vld [vmem:[%s5733_s20 + $0xf0] sm:$0xff] (!%p3855_p6)  }
  0x35   : > { %4127 = vmatpush3.bf16.msra.mxu1 %v4510_v25  ;;  %4106 = vmatprep.subr.bf16.mxu0 %v4511_v26  ;;  %v4546_v25 = vld [vmem:[%s5733_s20 + $0x30] sm:$0xff] (!%p3855_p6)  }
  0x36   : > { %4128 = vmatprep.subr.bf16.mxu1 %v4512_v27  ;;  %v4547_v26 = vld [vmem:[%s5733_s20 + $0xb0] sm:$0xff] (!%p3855_p6)   ;;  %v4548_v27 = vld [vmem:[%s5733_s20 + $0x78] sm:$0xff] (!%p3855_p6)  }
  0x38   : > { %4107 = vmatpush3.bf16.msra.mxu0 %v4513_v28  ;;  %v4549_v28 = vld [vmem:[%s5733_s20 + $0xf8] sm:$0xff] (!%p3855_p6)  }
  0x39   : > { %4129 = vmatpush3.bf16.msra.mxu1 %v4514_v29  ;;  %4108 = vmatprep.subr.bf16.mxu0 %v4515_v30  ;;  %v4550_v29 = vld [vmem:[%s5733_s20 + $0x38] sm:$0xff] (!%p3855_p6)  }
  0x3a   : > { %4130 = vmatprep.subr.bf16.mxu1 %v4516_v31  ;;  %v4551_v30 = vld [vmem:[%s5733_s20 + $0xb8] sm:$0xff] (!%p3855_p6)   ;;  %v1058_v31 = vld [vmem:[%s5734_s22] sm:$0xff] (!%p3855_p6) }
  0x3b   : > { %v1079_v32 = vrot.slane (!%p3855_p6), %v1058_v31, %v4931_v41 }
  0x3c   : > { %4109 = vmatpush3.bf16.msra.mxu0 %v4517_v33  ;;  %v1072_v33 = vcombine.high (!%p3855_p6), %v1058_v31, %v1058_v31  ;;  %v4597_v31 = vld [vmem:[%s5733_s20 + $0x290] sm:$0xff] (!%p3855_p6)  }
  0x3d   : > { %4131 = vmatpush3.bf16.msra.mxu1 %v4518_v34  ;;  %4138 = vmatprep.subr.bf16.mxu0 (!%p3855_p6), %v4520_v63  ;;  %v4553_v34 = vld [vmem:[%s5733_s20 + $0x140] sm:$0xff] (!%p3855_p6)   ;;  %v1087_v36 = vcombine.high (!%p3855_p6), %v1079_v32, %v1079_v32  ;;  %v1206_v38 = vpack.c.bf16 (!%p3855_p6), %v1079_v32, %v1079_v32  ;;  %v4574_v63 = vld [vmem:[%s5733_s20 + $0x1e8] sm:$0xff] (!%p3855_p6)   ;;  %v4598_v32 = vld [vmem:[%s5733_s20 + $0x258] sm:$0xff] (!%p3855_p6)  }
  0x3e   : > { %4160 = vmatprep.subr.bf16.mxu1 (!%p3855_p6), %v4521_v0  ;;  %v1086_v37 = vrot.slane (!%p3855_p6), %v1072_v33, %v4931_v41  ;;  %v4575_v0 = vld [vmem:[%s5733_s20 + $0x128] sm:$0xff] (!%p3855_p6)   ;;  %v4599_v33 = vld [vmem:[%s5733_s20 + $0x2d8] sm:$0xff] (!%p3855_p6)  }
  0x3f   : > { %992 = vmatmul.mubr.bf16.vlgmr.msra.gmra.mrb[0].mxu0 %v699_v46  ;;  %v1207_v40 = vpack.c.bf16 (!%p3855_p6), %v1087_v36, %v1087_v36  ;;  %v4602_v36 = vld [vmem:[%s5733_s20 + $0x260] sm:$0xff] (!%p3855_p6)  }
  0x40   : > { %1032 = vmatmul.mubr.bf16.vlgmr.msra.gmra.mrb[0].mxu1 %v701_v47  ;;  %4139 = vmatpush3.bf16.msra.mxu0 (!%p3855_p6), %v4522_v1  ;;  %v1088_v42 = vcombine.high (!%p3855_p6), %v1086_v37, %v1086_v37  ;;  %v1208_v44 = vpack.c.bf16 (!%p3855_p6), %v1086_v37, %v1086_v37  ;;  %v4558_v47 = vld [vmem:[%s5733_s20 + $0x1c8] sm:$0xff] (!%p3855_p6)   ;;  %v4603_v37 = vld [vmem:[%s5733_s20 + $0x2e0] sm:$0xff] (!%p3855_p6)  }
  0x41   : > { %4161 = vmatpush3.bf16.msra.mxu1 (!%p3855_p6), %v4523_v2  ;;  %4140 = vmatprep.subr.bf16.mxu0 (!%p3855_p6), %v4524_v3  ;;  %v4576_v1 = vld [vmem:[%s5733_s20 + $0x1a8] sm:$0xff] (!%p3855_p6)   ;;  %v4577_v2 = vld [vmem:[%s5733_s20 + $0x170] sm:$0xff] (!%p3855_p6)  }
  0x42   : > { %4162 = vmatprep.subr.bf16.mxu1 (!%p3855_p6), %v4525_v4  ;;  %2842 = vmatprep.mubr.bf16.mxu0 (!%p3855_p6), %v1207_v40  ;;  %v1209_v46 = vpack.c.bf16 (!%p3855_p6), %v1088_v42, %v1088_v42  ;;  %v4578_v3 = vld [vmem:[%s5733_s20 + $0x1f0] sm:$0xff] (!%p3855_p6)   ;;  %v4606_v40 = vld [vmem:[%s5733_s20 + $0x268] sm:$0xff] (!%p3855_p6)  }
  0x43   : > { %v4579_v4 = vld [vmem:[%s5733_s20 + $0x130] sm:$0xff] (!%p3855_p6)   ;;  %v4607_v42 = vld [vmem:[%s5733_s20 + $0x2e8] sm:$0xff] (!%p3855_p6)  }
  0x44   : > { %4141 = vmatpush3.bf16.msra.mxu0 (!%p3855_p6), %v4526_v5  ;;  %2882 = vmatprep.mubr.bf16.mxu1 (!%p3855_p6), %v1209_v46  ;;  %v4580_v5 = vld [vmem:[%s5733_s20 + $0x1b0] sm:$0xff] (!%p3855_p6)  }
  0x45   : > { %4163 = vmatpush3.bf16.msra.mxu1 (!%p3855_p6), %v4527_v6  ;;  %4142 = vmatprep.subr.bf16.mxu0 (!%p3855_p6), %v4528_v7  ;;  %v4581_v6 = vld [vmem:[%s5733_s20 + $0x178] sm:$0xff] (!%p3855_p6)   ;;  %v4611_v46 = vld [vmem:[%s5733_s20 + $0x2f0] sm:$0xff] (!%p3855_p6)  }
  0x46   : > { %4164 = vmatprep.subr.bf16.mxu1 (!%p3855_p6), %v4529_v8  ;;  %v4582_v7 = vld [vmem:[%s5733_s20 + $0x1f8] sm:$0xff] (!%p3855_p6)  }
  0x47   : > { %v4583_v8 = vld [vmem:[%s5733_s20 + $0x138] sm:$0xff] (!%p3855_p6)  }
  0x48   : > { %4143 = vmatpush3.bf16.msra.mxu0 (!%p3855_p6), %v4530_v9  ;;  %v1059_v9 = vld [vmem:[%s5734_s22 + $0x8] sm:$0xff] (!%p3855_p6) }
  0x49   : > { %4165 = vmatpush3.bf16.msra.mxu1 (!%p3855_p6), %v4531_v10  ;;  %4144 = vmatprep.subr.bf16.mxu0 (!%p3855_p6), %v4532_v11  ;;  %v4584_v10 = vld [vmem:[%s5733_s20 + $0x1b8] sm:$0xff] (!%p3855_p6)   ;;  %v1096_v11 = vrot.slane (!%p3855_p6), %v1059_v9, %v4931_v41 }
  0x4a   : > { %4166 = vmatprep.subr.bf16.mxu1 (!%p3855_p6), %v4533_v12  ;;  %v1089_v12 = vcombine.high (!%p3855_p6), %v1059_v9, %v1059_v9  ;;  %v4629_v9 = vld [vmem:[%s5733_s20 + $0x310] sm:$0xff] (!%p3855_p6)  }
  0x4c   : > { %4145 = vmatpush3.bf16.msra.mxu0 (!%p3855_p6), %v4534_v13  ;;  %v4586_v13 = vld [vmem:[%s5733_s20 + $0x240] sm:$0xff] (!%p3855_p6)  }
  0x4d   : > { %4167 = vmatpush3.bf16.msra.mxu1 (!%p3855_p6), %v4535_v14  ;;  %4146 = vmatprep.subr.bf16.mxu0 (!%p3855_p6), %v4536_v15  ;;  %v1104_v14 = vcombine.high (!%p3855_p6), %v1096_v11, %v1096_v11  ;;  %v1103_v15 = vrot.slane (!%p3855_p6), %v1089_v12, %v4931_v41  ;;  %v4632_v12 = vld [vmem:[%s5733_s20 + $0x3d8] sm:$0xff] (!%p3855_p6)  }
  0x4e   : > { %4168 = vmatprep.subr.bf16.mxu1 (!%p3855_p6), %v4537_v16  ;;  %v4587_v16 = vld [vmem:[%s5733_s20 + $0x2c0] sm:$0xff] (!%p3855_p6)  }
  0x50   : > { %4147 = vmatpush3.bf16.msra.mxu0 (!%p3855_p6), %v4538_v17  ;;  %v1210_v17 = vpack.c.bf16 (!%p3855_p6), %v1096_v11, %v1096_v11  ;;  %v4631_v11 = vld [vmem:[%s5733_s20 + $0x358] sm:$0xff] (!%p3855_p6)  }
  0x51   : > { %4169 = vmatpush3.bf16.msra.mxu1 (!%p3855_p6), %v4539_v18  ;;  %4148 = vmatprep.subr.bf16.mxu0 (!%p3855_p6), %v4540_v19  ;;  %v4588_v18 = vld [vmem:[%s5733_s20 + $0x200] sm:$0xff] (!%p3855_p6)   ;;  %v1211_v19 = vpack.c.bf16 (!%p3855_p6), %v1104_v14, %v1104_v14  ;;  %v4634_v14 = vld [vmem:[%s5733_s20 + $0x398] sm:$0xff] (!%p3855_p6)  }
  0x52   : > { %4170 = vmatprep.subr.bf16.mxu1 (!%p3855_p6), %v4541_v20  ;;  %v1105_v20 = vcombine.high (!%p3855_p6), %v1103_v15, %v1103_v15 }
  0x54   : > { %4149 = vmatpush3.bf16.msra.mxu0 (!%p3855_p6), %v4542_v21  ;;  %v4589_v21 = vld [vmem:[%s5733_s20 + $0x280] sm:$0xff] (!%p3855_p6)  }
  0x55   : > { %4171 = vmatpush3.bf16.msra.mxu1 (!%p3855_p6), %v4543_v22  ;;  %4150 = vmatprep.subr.bf16.mxu0 (!%p3855_p6), %v4544_v23  ;;  %v1212_v22 = vpack.c.bf16 (!%p3855_p6), %v1103_v15, %v1103_v15  ;;  %v4590_v23 = vld [vmem:[%s5733_s20 + $0x248] sm:$0xff] (!%p3855_p6)   ;;  %v4635_v15 = vld [vmem:[%s5733_s20 + $0x360] sm:$0xff] (!%p3855_p6)  }
  0x56   : > { %4172 = vmatprep.subr.bf16.mxu1 (!%p3855_p6), %v4545_v24  ;;  %v1213_v24 = vpack.c.bf16 (!%p3855_p6), %v1105_v20, %v1105_v20  ;;  %v4640_v20 = vld [vmem:[%s5733_s20 + $0x3e8] sm:$0xff] (!%p3855_p6)  }
  0x58   : > { %4151 = vmatpush3.bf16.msra.mxu0 (!%p3855_p6), %v4546_v25  ;;  %v4591_v25 = vld [vmem:[%s5733_s20 + $0x2c8] sm:$0xff] (!%p3855_p6)  }
  0x59   : > { %4173 = vmatpush3.bf16.msra.mxu1 (!%p3855_p6), %v4547_v26  ;;  %4152 = vmatprep.subr.bf16.mxu0 (!%p3855_p6), %v4548_v27  ;;  %v4592_v26 = vld [vmem:[%s5733_s20 + $0x208] sm:$0xff] (!%p3855_p6)  }
  0x5a   : > { %4174 = vmatprep.subr.bf16.mxu1 (!%p3855_p6), %v4549_v28  ;;  %v4593_v27 = vld [vmem:[%s5733_s20 + $0x288] sm:$0xff] (!%p3855_p6)   ;;  %v4594_v28 = vld [vmem:[%s5733_s20 + $0x250] sm:$0xff] (!%p3855_p6)  }
  0x5c   : > { %4153 = vmatpush3.bf16.msra.mxu0 (!%p3855_p6), %v4550_v29  ;;  %v4595_v29 = vld [vmem:[%s5733_s20 + $0x2d0] sm:$0xff] (!%p3855_p6)  }
  0x5d   : > { %4175 = vmatpush3.bf16.msra.mxu1 (!%p3855_p6), %v4551_v30  ;;  %4182 = vmatprep.subr.bf16.mxu0 (!%p3855_p6), %v4553_v34  ;;  %v4596_v30 = vld [vmem:[%s5733_s20 + $0x210] sm:$0xff] (!%p3855_p6)   ;;  %v4600_v34 = vld [vmem:[%s5733_s20 + $0x218] sm:$0xff] (!%p3855_p6)  }
  0x5e   : > { %4204 = vmatprep.subr.bf16.mxu1 (!%p3855_p6), %v4554_v35  ;;  %v4601_v35 = vld [vmem:[%s5733_s20 + $0x298] sm:$0xff] (!%p3855_p6)  }
 0x112   : > { %v4110_v50 = vpop.f32.mrb[0].mxu0 }
 0x113   : > { %v4132_v51 = vpop.f32.mrb[0].mxu1  ;;  %v4111_v52 = vpop.f32.mrb[1].mxu0 }
 0x114   : > { %v4133_v53 = vpop.f32.mrb[1].mxu1  ;;  %v4112_v54 = vadd.f32 %v4111_v52, %v4110_v50  ;;  %v4113_v56 = vpop.f32.mrb[2].mxu0  ;;  %v4561_v50 = vld [vmem:[%s5733_s20 + $0x150] sm:$0xff] (!%p3855_p6)  }
 0x115   : > { %v4134_v55 = vadd.f32 %v4133_v53, %v4132_v51  ;;  %v4135_v57 = vpop.f32.mrb[2].mxu1  ;;  %v4114_v59 = vpop.f32.mrb[3].mxu0  ;;  %1045 = sbr.rel (%p3855_p6) target bundleno = 885 (0x375), region = 112  ;;  %2843 = vmatmul.mubr.bf16.vlgmr.msra.gmra.mrb[0].mxu0 (!%p3855_p6), %v1206_v38  ;;  %v4562_v51 = vld [vmem:[%s5733_s20 + $0x1d0] sm:$0xff] (!%p3855_p6)   ;;  %v4567_v56 = vld [vmem:[%s5733_s20 + $0x118] sm:$0xff] (!%p3855_p6)   ;;  %v4604_v38 = vld [vmem:[%s5733_s20 + $0x220] sm:$0xff] (!%p3855_p6)  }
 0x116   : > { %v4136_v60 = vpop.f32.mrb[3].mxu1  ;;  %4183 = vmatpush3.bf16.msra.mxu0 (!%p3855_p6), %v4555_v39  ;;  %2883 = vmatmul.mubr.bf16.vlgmr.msra.gmra.mrb[0].mxu1 (!%p3855_p6), %v1208_v44  ;;  %v4563_v52 = vld [vmem:[%s5733_s20 + $0x110] sm:$0xff] (!%p3855_p6)   ;;  %v4568_v57 = vld [vmem:[%s5733_s20 + $0x198] sm:$0xff] (!%p3855_p6)   ;;  %v4570_v59 = vld [vmem:[%s5733_s20 + $0x1e0] sm:$0xff] (!%p3855_p6)  }
 0x117   : > { %v1034_v61 = vadd.f32 %v4134_v55, %v4112_v54  ;;  %4184 = vmatprep.subr.bf16.mxu0 (!%p3855_p6), %v4557_v45  ;;  %4205 = vmatpush3.bf16.msra.mxu1 (!%p3855_p6), %v4556_v43  ;;  %v4564_v53 = vld [vmem:[%s5733_s20 + $0x190] sm:$0xff] (!%p3855_p6)   ;;  %v4565_v54 = vld [vmem:[%s5733_s20 + $0x158] sm:$0xff] (!%p3855_p6)   ;;  %v4571_v60 = vld [vmem:[%s5733_s20 + $0x120] sm:$0xff] (!%p3855_p6)  }
 0x118   : > { %4206 = vmatprep.subr.bf16.mxu1 (!%p3855_p6), %v4558_v47  ;;  %v4566_v55 = vld [vmem:[%s5733_s20 + $0x1d8] sm:$0xff] (!%p3855_p6)   ;;  %2922 = vmatprep.mubr.bf16.mxu0 (!%p3855_p6), %v1211_v19  ;;  %v4605_v39 = vld [vmem:[%s5733_s20 + $0x2a0] sm:$0xff] (!%p3855_p6)   ;;  %v4608_v43 = vld [vmem:[%s5733_s20 + $0x228] sm:$0xff] (!%p3855_p6)  }
 0x119   : > { %v1039_v62 = vadd.f32 %v1034_v61, %v675_v58  ;;  %v4569_v58 = vld [vmem:[%s5733_s20 + $0x160] sm:$0xff] (!%p3855_p6)   ;;  %2962 = vmatprep.mubr.bf16.mxu1 (!%p3855_p6), %v1213_v24  ;;  %v4609_v44 = vld [vmem:[%s5733_s20 + $0x2a8] sm:$0xff] (!%p3855_p6)   ;;  %v4610_v45 = vld [vmem:[%s5733_s20 + $0x270] sm:$0xff] (!%p3855_p6)  }
 0x11a   : > { %4185 = vmatpush3.bf16.msra.mxu0 (!%p3855_p6), %v4559_v48  ;;  %v4572_v61 = vld [vmem:[%s5733_s20 + $0x1a0] sm:$0xff] (!%p3855_p6)   ;;  %v4612_v47 = vld [vmem:[%s5733_s20 + $0x230] sm:$0xff] (!%p3855_p6)   ;;  %v4639_v19 = vld [vmem:[%s5733_s20 + $0x368] sm:$0xff] (!%p3855_p6)  }
 0x11b   : > { %1041 = vst.msk [vmem:[#allocation2] sm:$0x3] %vm1040_vm1, %v1039_v62  ;;  %4186 = vmatprep.subr.bf16.mxu0 (!%p3855_p6), %v4561_v50  ;;  %4207 = vmatpush3.bf16.msra.mxu1 (!%p3855_p6), %v4560_v49  ;;  %v4573_v62 = vld [vmem:[%s5733_s20 + $0x168] sm:$0xff] (!%p3855_p6)   ;;  %v4613_v48 = vld [vmem:[%s5733_s20 + $0x2b0] sm:$0xff] (!%p3855_p6)   ;;  %v4614_v49 = vld [vmem:[%s5733_s20 + $0x278] sm:$0xff] (!%p3855_p6)  }
 0x11c   : > { %4208 = vmatprep.subr.bf16.mxu1 %v4562_v51  ;;  %v4615_v50 = vld [vmem:[%s5733_s20 + $0x2f8] sm:$0xff]   ;;  %v4644_v24 = vld [vmem:[%s5733_s20 + $0x3f0] sm:$0xff]  }
 0x11d   : > { %v4616_v51 = vld [vmem:[%s5733_s20 + $0x238] sm:$0xff]  }
 0x11e   : > { %4187 = vmatpush3.bf16.msra.mxu0 %v4563_v52  ;;  %v1060_v52 = vld [vmem:[%s5734_s22 + $0x10] sm:$0xff] }
 0x11f   : > { %4188 = vmatprep.subr.bf16.mxu0 %v4565_v54  ;;  %4209 = vmatpush3.bf16.msra.mxu1 %v4564_v53  ;;  %v4617_v53 = vld [vmem:[%s5733_s20 + $0x2b8] sm:$0xff]   ;;  %v1113_v54 = vrot.slane %v1060_v52, %v4931_v41 }
 0x120   : > { %4210 = vmatprep.subr.bf16.mxu1 %v4566_v55  ;;  %v1106_v55 = vcombine.high %v1060_v52, %v1060_v52  ;;  %v4662_v52 = vld [vmem:[%s5733_s20 + $0x410] sm:$0xff]  }
 0x122   : > { %4189 = vmatpush3.bf16.msra.mxu0 %v4567_v56  ;;  %v4619_v56 = vld [vmem:[%s5733_s20 + $0x340] sm:$0xff]  }
 0x123   : > { %4190 = vmatprep.subr.bf16.mxu0 %v4569_v58  ;;  %4211 = vmatpush3.bf16.msra.mxu1 %v4568_v57  ;;  %v1121_v57 = vcombine.high %v1113_v54, %v1113_v54  ;;  %v1120_v58 = vrot.slane %v1106_v55, %v4931_v41  ;;  %v4665_v55 = vld [vmem:[%s5733_s20 + $0x4d8] sm:$0xff]  }
 0x124   : > { %4212 = vmatprep.subr.bf16.mxu1 %v4570_v59  ;;  %v4620_v59 = vld [vmem:[%s5733_s20 + $0x3c0] sm:$0xff]  }
 0x126   : > { %4191 = vmatpush3.bf16.msra.mxu0 %v4571_v60  ;;  %v1214_v60 = vpack.c.bf16 %v1113_v54, %v1113_v54  ;;  %v4663_v54 = vld [vmem:[%s5733_s20 + $0x490] sm:$0xff]  }
 0x127   : > { %4192 = vmatprep.subr.bf16.mxu0 %v4573_v62  ;;  %4213 = vmatpush3.bf16.msra.mxu1 %v4572_v61  ;;  %v4621_v61 = vld [vmem:[%s5733_s20 + $0x300] sm:$0xff]   ;;  %v1215_v62 = vpack.c.bf16 %v1121_v57, %v1121_v57 }
 0x128   : > { %4214 = vmatprep.subr.bf16.mxu1 %v4574_v63  ;;  %v1122_v63 = vcombine.high %v1120_v58, %v1120_v58  ;;  %v4668_v57 = vld [vmem:[%s5733_s20 + $0x460] sm:$0xff]  }
 0x12a   : > { %4193 = vmatpush3.bf16.msra.mxu0 %v4575_v0  ;;  %v4622_v0 = vld [vmem:[%s5733_s20 + $0x380] sm:$0xff]  }
 0x12b   : > { %4194 = vmatprep.subr.bf16.mxu0 %v4577_v2  ;;  %4215 = vmatpush3.bf16.msra.mxu1 %v4576_v1  ;;  %v1216_v1 = vpack.c.bf16 %v1120_v58, %v1120_v58  ;;  %v4623_v2 = vld [vmem:[%s5733_s20 + $0x348] sm:$0xff]   ;;  %v4667_v58 = vld [vmem:[%s5733_s20 + $0x498] sm:$0xff]  }
 0x12c   : > { %4216 = vmatprep.subr.bf16.mxu1 %v4578_v3  ;;  %v1217_v3 = vpack.c.bf16 %v1122_v63, %v1122_v63  ;;  %v4673_v63 = vld [vmem:[%s5733_s20 + $0x4e8] sm:$0xff]  }
 0x12e   : > { %4195 = vmatpush3.bf16.msra.mxu0 %v4579_v4  ;;  %v4624_v4 = vld [vmem:[%s5733_s20 + $0x3c8] sm:$0xff]  }
 0x12f   : > { %4196 = vmatprep.subr.bf16.mxu0 %v4581_v6  ;;  %4217 = vmatpush3.bf16.msra.mxu1 %v4580_v5  ;;  %v4625_v5 = vld [vmem:[%s5733_s20 + $0x308] sm:$0xff]  }
 0x130   : > { %4218 = vmatprep.subr.bf16.mxu1 %v4582_v7  ;;  %v4626_v6 = vld [vmem:[%s5733_s20 + $0x388] sm:$0xff]   ;;  %v4627_v7 = vld [vmem:[%s5733_s20 + $0x350] sm:$0xff]  }
 0x132   : > { %4197 = vmatpush3.bf16.msra.mxu0 %v4583_v8  ;;  %v4628_v8 = vld [vmem:[%s5733_s20 + $0x3d0] sm:$0xff]  }
 0x133   : > { %4226 = vmatprep.subr.bf16.mxu0 %v4586_v13  ;;  %4219 = vmatpush3.bf16.msra.mxu1 %v4584_v10  ;;  %v4630_v10 = vld [vmem:[%s5733_s20 + $0x390] sm:$0xff]   ;;  %v4633_v13 = vld [vmem:[%s5733_s20 + $0x318] sm:$0xff]  }
 0x134   : > { %4248 = vmatprep.subr.bf16.mxu1 %v4587_v16  ;;  %v4636_v16 = vld [vmem:[%s5733_s20 + $0x3e0] sm:$0xff]  }
 0x135   : > { %2923 = vmatmul.mubr.bf16.vlgmr.msra.gmra.mrb[4].mxu0 %v1210_v17  ;;  %v4637_v17 = vld [vmem:[%s5733_s20 + $0x320] sm:$0xff]  }
 0x136   : > { %4227 = vmatpush3.bf16.msra.mxu0 %v4588_v18  ;;  %2963 = vmatmul.mubr.bf16.vlgmr.msra.gmra.mrb[4].mxu1 %v1212_v22  ;;  %v4638_v18 = vld [vmem:[%s5733_s20 + $0x3a0] sm:$0xff]   ;;  %v4642_v22 = vld [vmem:[%s5733_s20 + $0x3a8] sm:$0xff]  }
 0x137   : > { %4228 = vmatprep.subr.bf16.mxu0 %v4590_v23  ;;  %4249 = vmatpush3.bf16.msra.mxu1 %v4589_v21  ;;  %v4641_v21 = vld [vmem:[%s5733_s20 + $0x328] sm:$0xff]   ;;  %v4643_v23 = vld [vmem:[%s5733_s20 + $0x370] sm:$0xff]  }
 0x138   : > { %4250 = vmatprep.subr.bf16.mxu1 %v4591_v25  ;;  %3002 = vmatprep.mubr.bf16.mxu0 %v1215_v62  ;;  %v4645_v25 = vld [vmem:[%s5733_s20 + $0x330] sm:$0xff]   ;;  %v4671_v62 = vld [vmem:[%s5733_s20 + $0x4a0] sm:$0xff]  }
 0x139   : > { %3042 = vmatprep.mubr.bf16.mxu1 %v1217_v3  ;;  %v4677_v3 = vld [vmem:[%s5733_s20 + $0x4f0] sm:$0xff]  }
 0x13a   : > { %4229 = vmatpush3.bf16.msra.mxu0 %v4592_v26  ;;  %v4646_v26 = vld [vmem:[%s5733_s20 + $0x3b0] sm:$0xff]  }
 0x13b   : > { %4230 = vmatprep.subr.bf16.mxu0 %v4594_v28  ;;  %4251 = vmatpush3.bf16.msra.mxu1 %v4593_v27  ;;  %v4647_v27 = vld [vmem:[%s5733_s20 + $0x378] sm:$0xff]  }
 0x13c   : > { %4252 = vmatprep.subr.bf16.mxu1 %v4595_v29  ;;  %v4648_v28 = vld [vmem:[%s5733_s20 + $0x3f8] sm:$0xff]  }
 0x13d   : > { %v4649_v29 = vld [vmem:[%s5733_s20 + $0x338] sm:$0xff]  }
 0x13e   : > { %4231 = vmatpush3.bf16.msra.mxu0 %v4596_v30  ;;  %v1061_v30 = vld [vmem:[%s5734_s22 + $0x18] sm:$0xff] }
 0x13f   : > { %4232 = vmatprep.subr.bf16.mxu0 %v4598_v32  ;;  %4253 = vmatpush3.bf16.msra.mxu1 %v4597_v31  ;;  %v1130_v31 = vrot.slane %v1061_v30, %v4931_v41  ;;  %v1123_v32 = vcombine.high %v1061_v30, %v1061_v30  ;;  %v4695_v30 = vld [vmem:[%s5733_s20 + $0x510] sm:$0xff]  }
 0x140   : > { %4254 = vmatprep.subr.bf16.mxu1 %v4599_v33  ;;  %v4652_v33 = vld [vmem:[%s5733_s20 + $0x440] sm:$0xff]  }
 0x142   : > { %4233 = vmatpush3.bf16.msra.mxu0 %v4600_v34  ;;  %v4650_v34 = vld [vmem:[%s5733_s20 + $0x3b8] sm:$0xff]  }
 0x143   : > { %4234 = vmatprep.subr.bf16.mxu0 %v4602_v36  ;;  %4255 = vmatpush3.bf16.msra.mxu1 %v4601_v35  ;;  %v1138_v35 = vcombine.high %v1130_v31, %v1130_v31  ;;  %v1137_v36 = vrot.slane %v1123_v32, %v4931_v41  ;;  %v4696_v32 = vld [vmem:[%s5733_s20 + $0x590] sm:$0xff]  }
 0x144   : > { %4256 = vmatprep.subr.bf16.mxu1 %v4603_v37  ;;  %v4653_v37 = vld [vmem:[%s5733_s20 + $0x4c0] sm:$0xff]  }
 0x146   : > { %4235 = vmatpush3.bf16.msra.mxu0 %v4604_v38  ;;  %v1218_v38 = vpack.c.bf16 %v1130_v31, %v1130_v31  ;;  %v4697_v31 = vld [vmem:[%s5733_s20 + $0x558] sm:$0xff]  }
 0x147   : > { %4236 = vmatprep.subr.bf16.mxu0 %v4606_v40  ;;  %4257 = vmatpush3.bf16.msra.mxu1 %v4605_v39  ;;  %v1219_v39 = vpack.c.bf16 %v1138_v35, %v1138_v35  ;;  %v1139_v40 = vcombine.high %v1137_v36, %v1137_v36  ;;  %v4701_v35 = vld [vmem:[%s5733_s20 + $0x560] sm:$0xff]  }
 0x148   : > { %4258 = vmatprep.subr.bf16.mxu1 %v4607_v42  ;;  %v4654_v42 = vld [vmem:[%s5733_s20 + $0x400] sm:$0xff]  }
 0x14a   : > { %4237 = vmatpush3.bf16.msra.mxu0 %v4608_v43  ;;  %v1220_v43 = vpack.c.bf16 %v1137_v36, %v1137_v36  ;;  %v4700_v36 = vld [vmem:[%s5733_s20 + $0x598] sm:$0xff]  }
 0x14b   : > { %4238 = vmatprep.subr.bf16.mxu0 %v4610_v45  ;;  %4259 = vmatpush3.bf16.msra.mxu1 %v4609_v44  ;;  %v4656_v44 = vld [vmem:[%s5733_s20 + $0x448] sm:$0xff]   ;;  %v1221_v45 = vpack.c.bf16 %v1139_v40, %v1139_v40  ;;  %v4704_v40 = vld [vmem:[%s5733_s20 + $0x5a0] sm:$0xff]  }
 0x14c   : > { %4260 = vmatprep.subr.bf16.mxu1 %v4611_v46  ;;  %v4655_v46 = vld [vmem:[%s5733_s20 + $0x480] sm:$0xff]  }
 0x14e   : > { %4239 = vmatpush3.bf16.msra.mxu0 %v4612_v47  ;;  %v4657_v47 = vld [vmem:[%s5733_s20 + $0x4c8] sm:$0xff]  }
 0x14f   : > { %4240 = vmatprep.subr.bf16.mxu0 %v4614_v49  ;;  %4261 = vmatpush3.bf16.msra.mxu1 %v4613_v48  ;;  %v4658_v48 = vld [vmem:[%s5733_s20 + $0x408] sm:$0xff]   ;;  %v4660_v49 = vld [vmem:[%s5733_s20 + $0x450] sm:$0xff]  }
 0x150   : > { %4262 = vmatprep.subr.bf16.mxu1 %v4615_v50  ;;  %v4659_v50 = vld [vmem:[%s5733_s20 + $0x488] sm:$0xff]  }
 0x152   : > { %4241 = vmatpush3.bf16.msra.mxu0 %v4616_v51  ;;  %v4661_v51 = vld [vmem:[%s5733_s20 + $0x4d0] sm:$0xff]  }
 0x153   : > { %4270 = vmatprep.subr.bf16.mxu0 %v4619_v56  ;;  %4263 = vmatpush3.bf16.msra.mxu1 %v4617_v53  ;;  %v4664_v53 = vld [vmem:[%s5733_s20 + $0x458] sm:$0xff]  }
 0x154   : > { %4292 = vmatprep.subr.bf16.mxu1 %v4620_v59  ;;  %v4666_v56 = vld [vmem:[%s5733_s20 + $0x418] sm:$0xff]   ;;  %v4669_v59 = vld [vmem:[%s5733_s20 + $0x4e0] sm:$0xff]  }
 0x155   : > { %3003 = vmatmul.mubr.bf16.vlgmr.msra.gmra.mrb[8].mxu0 %v1214_v60  ;;  %v4670_v60 = vld [vmem:[%s5733_s20 + $0x420] sm:$0xff]  }
 0x156   : > { %4271 = vmatpush3.bf16.msra.mxu0 %v4621_v61  ;;  %3043 = vmatmul.mubr.bf16.vlgmr.msra.gmra.mrb[8].mxu1 %v1216_v1  ;;  %v4672_v61 = vld [vmem:[%s5733_s20 + $0x468] sm:$0xff]   ;;  %v4676_v1 = vld [vmem:[%s5733_s20 + $0x470] sm:$0xff]  }
 0x157   : > { %4272 = vmatprep.subr.bf16.mxu0 %v4623_v2  ;;  %4293 = vmatpush3.bf16.msra.mxu1 %v4622_v0  ;;  %v4674_v0 = vld [vmem:[%s5733_s20 + $0x428] sm:$0xff]  }
 0x158   : > { %4294 = vmatprep.subr.bf16.mxu1 %v4624_v4  ;;  %3082 = vmatprep.mubr.bf16.mxu0 %v1219_v39  ;;  %v4675_v2 = vld [vmem:[%s5733_s20 + $0x4a8] sm:$0xff]   ;;  %v4678_v4 = vld [vmem:[%s5733_s20 + $0x430] sm:$0xff]  }
 0x159   : > { %3122 = vmatprep.mubr.bf16.mxu1 %v1221_v45  ;;  %v4705_v39 = vld [vmem:[%s5733_s20 + $0x568] sm:$0xff]  }
 0x15a   : > { %4273 = vmatpush3.bf16.msra.mxu0 %v4625_v5  ;;  %v4680_v5 = vld [vmem:[%s5733_s20 + $0x478] sm:$0xff]   ;;  %v4708_v45 = vld [vmem:[%s5733_s20 + $0x5a8] sm:$0xff]  }
 0x15b   : > { %4274 = vmatprep.subr.bf16.mxu0 %v4627_v7  ;;  %4295 = vmatpush3.bf16.msra.mxu1 %v4626_v6  ;;  %v4679_v6 = vld [vmem:[%s5733_s20 + $0x4b0] sm:$0xff]   ;;  %v4681_v7 = vld [vmem:[%s5733_s20 + $0x4f8] sm:$0xff]  }
 0x15c   : > { %4296 = vmatprep.subr.bf16.mxu1 %v4628_v8  ;;  %v1062_v8 = vld [vmem:[%s5734_s22 + $0x20] sm:$0xff] }
 0x15e   : > { %4275 = vmatpush3.bf16.msra.mxu0 %v4629_v9  ;;  %v4682_v9 = vld [vmem:[%s5733_s20 + $0x438] sm:$0xff]  }
 0x15f   : > { %4276 = vmatprep.subr.bf16.mxu0 %v4631_v11  ;;  %4297 = vmatpush3.bf16.msra.mxu1 %v4630_v10  ;;  %v1147_v10 = vrot.slane %v1062_v8, %v4931_v41  ;;  %v1140_v11 = vcombine.high %v1062_v8, %v1062_v8  ;;  %v3333_v8 = vld [vmem:[%s5707_s6] sm:$0x3] }
 0x160   : > { %4298 = vmatprep.subr.bf16.mxu1 %v4632_v12  ;;  %v4685_v12 = vld [vmem:[%s5733_s20 + $0x540] sm:$0xff]  }
 0x162   : > { %4277 = vmatpush3.bf16.msra.mxu0 %v4633_v13  ;;  %v4683_v13 = vld [vmem:[%s5733_s20 + $0x4b8] sm:$0xff]  }
 0x163   : > { %4278 = vmatprep.subr.bf16.mxu0 %v4635_v15  ;;  %4299 = vmatpush3.bf16.msra.mxu1 %v4634_v14  ;;  %v1155_v14 = vcombine.high %v1147_v10, %v1147_v10  ;;  %v1154_v15 = vrot.slane %v1140_v11, %v4931_v41  ;;  %v4727_v11 = vld [vmem:[%s5711_s10] sm:$0xff]  }
 0x164   : > { %4300 = vmatprep.subr.bf16.mxu1 %v4636_v16  ;;  %v1222_v16 = vpack.c.bf16 %v1147_v10, %v1147_v10  ;;  %v4726_v10 = vld [vmem:[%s5714_s13 + $0x40] sm:$0xff]  }
 0x166   : > { %4279 = vmatpush3.bf16.msra.mxu0 %v4637_v17  ;;  %v4686_v17 = vld [vmem:[%s5733_s20 + $0x5c0] sm:$0xff]  }
 0x167   : > { %4280 = vmatprep.subr.bf16.mxu0 %v4639_v19  ;;  %4301 = vmatpush3.bf16.msra.mxu1 %v4638_v18  ;;  %v1223_v18 = vpack.c.bf16 %v1155_v14, %v1155_v14  ;;  %v1156_v19 = vcombine.high %v1154_v15, %v1154_v15  ;;  %v4729_v14 = vld [vmem:[%s5714_s13 + $0x48] sm:$0xff]  }
 0x168   : > { %4302 = vmatprep.subr.bf16.mxu1 %v4640_v20  ;;  %v4687_v20 = vld [vmem:[%s5733_s20 + $0x500] sm:$0xff]  }
 0x16a   : > { %4281 = vmatpush3.bf16.msra.mxu0 %v4641_v21  ;;  %v1224_v21 = vpack.c.bf16 %v1154_v15, %v1154_v15  ;;  %v4730_v15 = vld [vmem:[%s5711_s10 + $0x8] sm:$0xff]  }
 0x16b   : > { %4282 = vmatprep.subr.bf16.mxu0 %v4643_v23  ;;  %4303 = vmatpush3.bf16.msra.mxu1 %v4642_v22  ;;  %v4689_v22 = vld [vmem:[%s5733_s20 + $0x548] sm:$0xff]   ;;  %v1225_v23 = vpack.c.bf16 %v1156_v19, %v1156_v19  ;;  %v4068_v19 = vld.sshfl [vmem:[%s5713_s12] sm:$0x33 pattern:$0x76325410] }
 0x16c   : > { %4304 = vmatprep.subr.bf16.mxu1 %v4644_v24  ;;  %v4688_v24 = vld [vmem:[%s5733_s20 + $0x580] sm:$0xff]  }
 0x16e   : > { %4283 = vmatpush3.bf16.msra.mxu0 %v4645_v25  ;;  %v4690_v25 = vld [vmem:[%s5733_s20 + $0x5c8] sm:$0xff]  }
 0x16f   : > { %4284 = vmatprep.subr.bf16.mxu0 %v4647_v27  ;;  %4305 = vmatpush3.bf16.msra.mxu1 %v4646_v26  ;;  %v4691_v26 = vld [vmem:[%s5733_s20 + $0x508] sm:$0xff]   ;;  %v4693_v27 = vld [vmem:[%s5733_s20 + $0x550] sm:$0xff]  }
 0x170   : > { %4306 = vmatprep.subr.bf16.mxu1 %v4648_v28  ;;  %v4692_v28 = vld [vmem:[%s5733_s20 + $0x588] sm:$0xff]  }
 0x172   : > { %4285 = vmatpush3.bf16.msra.mxu0 %v4649_v29  ;;  %v4694_v29 = vld [vmem:[%s5733_s20 + $0x5d0] sm:$0xff]  }
 0x173   : > { %4314 = vmatprep.subr.bf16.mxu0 %v4652_v33  ;;  %4307 = vmatpush3.bf16.msra.mxu1 %v4650_v34  ;;  %v4698_v33 = vld [vmem:[%s5733_s20 + $0x5d8] sm:$0xff]  }
 0x174   : > { %4336 = vmatprep.subr.bf16.mxu1 %v4653_v37  ;;  %v4699_v34 = vld [vmem:[%s5733_s20 + $0x518] sm:$0xff]   ;;  %v4702_v37 = vld [vmem:[%s5733_s20 + $0x5e0] sm:$0xff]  }
 0x175   : > { %3083 = vmatmul.mubr.bf16.vlgmr.msra.gmra.mrb[12].mxu0 %v1218_v38  ;;  %v4703_v38 = vld [vmem:[%s5733_s20 + $0x520] sm:$0xff]  }
 0x176   : > { %4315 = vmatpush3.bf16.msra.mxu0 %v4654_v42  ;;  %3123 = vmatmul.mubr.bf16.vlgmr.msra.gmra.mrb[12].mxu1 %v1220_v43  ;;  %v4706_v42 = vld [vmem:[%s5733_s20 + $0x5e8] sm:$0xff]  }
 0x177   : > { %4316 = vmatprep.subr.bf16.mxu0 %v4656_v44  ;;  %4337 = vmatpush3.bf16.msra.mxu1 %v4655_v46  ;;  %v4707_v43 = vld [vmem:[%s5733_s20 + $0x528] sm:$0xff]   ;;  %v4709_v44 = vld [vmem:[%s5733_s20 + $0x570] sm:$0xff]  }
 0x178   : > { %4338 = vmatprep.subr.bf16.mxu1 %v4657_v47  ;;  %3162 = vmatprep.mubr.bf16.mxu0 %v1223_v18  ;;  %v4710_v46 = vld [vmem:[%s5733_s20 + $0x5f0] sm:$0xff]  }
 0x179   : > { %3202 = vmatprep.mubr.bf16.mxu1 %v1225_v23  ;;  %v4711_v47 = vld [vmem:[%s5733_s20 + $0x530] sm:$0xff]   ;;  %v4736_v23 = vld [vmem:[%s5711_s10 + $0x18] sm:$0xff]  }
 0x17a   : > { %4317 = vmatpush3.bf16.msra.mxu0 %v4658_v48  ;;  %v4713_v48 = vld [vmem:[%s5733_s20 + $0x578] sm:$0xff]   ;;  %v4733_v18 = vld [vmem:[%s5711_s10 + $0x10] sm:$0xff]  }
 0x17b   : > { %4318 = vmatprep.subr.bf16.mxu0 %v4660_v49  ;;  %4339 = vmatpush3.bf16.msra.mxu1 %v4659_v50  ;;  %v4712_v49 = vld [vmem:[%s5733_s20 + $0x5b0] sm:$0xff]   ;;  %v4714_v50 = vld [vmem:[%s5733_s20 + $0x5f8] sm:$0xff]  }
 0x17c   : > { %4340 = vmatprep.subr.bf16.mxu1 %v4661_v51  ;;  %v1063_v51 = vld [vmem:[%s5734_s22 + $0x28] sm:$0xff] }
 0x17e   : > { %4319 = vmatpush3.bf16.msra.mxu0 %v4662_v52  ;;  %v4715_v52 = vld [vmem:[%s5733_s20 + $0x538] sm:$0xff]  }
 0x17f   : > { %4320 = vmatprep.subr.bf16.mxu0 %v4664_v53  ;;  %4341 = vmatpush3.bf16.msra.mxu1 %v4663_v54  ;;  %v1164_v53 = vrot.slane %v1063_v51, %v4931_v41  ;;  %v1157_v54 = vcombine.high %v1063_v51, %v1063_v51 }
 0x180   : > { %4342 = vmatprep.subr.bf16.mxu1 %v4665_v55  ;;  %v4716_v55 = vld [vmem:[%s5733_s20 + $0x5b8] sm:$0xff]  }
 0x182   : > { %4321 = vmatpush3.bf16.msra.mxu0 %v4666_v56  ;;  %v1172_v56 = vcombine.high %v1164_v53, %v1164_v53 }
 0x183   : > { %4322 = vmatprep.subr.bf16.mxu0 %v4668_v57  ;;  %4343 = vmatpush3.bf16.msra.mxu1 %v4667_v58  ;;  %v1171_v57 = vrot.slane %v1157_v54, %v4931_v41  ;;  %v1226_v58 = vpack.c.bf16 %v1164_v53, %v1164_v53  ;;  %v4719_v41 = vld [vmem:[%s5708_s7] sm:$0xff]  }
 0x184   : > { %4344 = vmatprep.subr.bf16.mxu1 %v4669_v59  ;;  %v1227_v59 = vpack.c.bf16 %v1172_v56, %v1172_v56 }
 0x186   : > { %4323 = vmatpush3.bf16.msra.mxu0 %v4670_v60  ;;  %v1173_v60 = vcombine.high %v1171_v57, %v1171_v57 }
 0x187   : > { %4324 = vmatprep.subr.bf16.mxu0 %v4672_v61  ;;  %4345 = vmatpush3.bf16.msra.mxu1 %v4671_v62  ;;  %v4718_v61 = vld [vmem:[%s5733_s20 + $0x600] sm:$0xff]   ;;  %v1228_v62 = vpack.c.bf16 %v1171_v57, %v1171_v57 }
 0x188   : > { %4346 = vmatprep.subr.bf16.mxu1 %v4673_v63  ;;  %v4760_v63 = vmov 0.0  }
 0x18a   : > { %4325 = vmatpush3.bf16.msra.mxu0 %v4674_v0  ;;  %v1229_v0 = vpack.c.bf16 %v1173_v60, %v1173_v60 }
 0x18b   : > { %4326 = vmatprep.subr.bf16.mxu0 %v4676_v1  ;;  %4347 = vmatpush3.bf16.msra.mxu1 %v4675_v2  ;;  %v4720_v1 = vld [vmem:[%s5733_s20 + $0x608] sm:$0xff]  }
 0x18c   : > { %4348 = vmatprep.subr.bf16.mxu1 %v4677_v3  ;;  %v4721_v2 = vld [vmem:[%s5708_s7 + $0x8] sm:$0xff]   ;;  %v4722_v3 = vld [vmem:[%s5733_s20 + $0x610] sm:$0xff]  }
 0x18e   : > { %4327 = vmatpush3.bf16.msra.mxu0 %v4678_v4  ;;  %v4723_v4 = vld [vmem:[%s5708_s7 + $0x10] sm:$0xff]  }
 0x18f   : > { %4328 = vmatprep.subr.bf16.mxu0 %v4680_v5  ;;  %4349 = vmatpush3.bf16.msra.mxu1 %v4679_v6  ;;  %v3857_v5 = vld.sshfl [vmem:[%s5734_s22 + $0x30] sm:$0x3 pattern:$0x76325410]  ;;  %v4724_v6 = vld [vmem:[%s5733_s20 + $0x618] sm:$0xff]  }
 0x190   : > { %4350 = vmatprep.subr.bf16.mxu1 %v4681_v7  ;;  %v4725_v7 = vld [vmem:[%s5708_s7 + $0x18] sm:$0xff]  }
 0x192   : > { %4329 = vmatpush3.bf16.msra.mxu0 %v4682_v9  ;;  %v1230_v9 = vpack.c.bf16 %v3857_v5, %v3857_v5 }
 0x193   : > { %4358 = vmatprep.subr.bf16.mxu0 %v4685_v12  ;;  %4351 = vmatpush3.bf16.msra.mxu1 %v4683_v13  ;;  %v3334_v12 = vpack.c.bf16 %v3333_v8, %v3333_v8  ;;  %v4728_v13 = vld [vmem:[%s5714_s13] sm:$0xff]  }
 0x194   : > { %4380 = vmatprep.subr.bf16.mxu1 %v4686_v17  ;;  %v4732_v17 = vld [vmem:[%s5714_s13 + $0x50] sm:$0xff]  }
 0x195   : > { %3163 = vmatmul.mubr.bf16.vlgmr.msra.gmra.mrb[16].mxu0 %v1222_v16  ;;  %v4731_v16 = vld [vmem:[%s5714_s13 + $0x8] sm:$0xff]  }
 0x196   : > { %4359 = vmatpush3.bf16.msra.mxu0 %v4687_v20  ;;  %3203 = vmatmul.mubr.bf16.vlgmr.msra.gmra.mrb[16].mxu1 %v1224_v21  ;;  %v4734_v20 = vld [vmem:[%s5714_s13 + $0x10] sm:$0xff]   ;;  %v3516_v21 = vcombine.high %v4068_v19, %v4068_v19 }
 0x197   : > { %4360 = vmatprep.subr.bf16.mxu0 %v4689_v22  ;;  %4381 = vmatpush3.bf16.msra.mxu1 %v4688_v24  ;;  %v4735_v22 = vld [vmem:[%s5714_s13 + $0x58] sm:$0xff]   ;;  %v3420_v24 = vld [vmem:[%s5710_s9] sm:$0x3] }
 0x198   : > { %4382 = vmatprep.subr.bf16.mxu1 %v4690_v25  ;;  %3242 = vmatprep.mubr.bf16.mxu0 %v1227_v59  ;;  %v3520_v25 = vpack.c.bf16 %v3516_v21, %v3516_v21 }
 0x199   : > { %3282 = vmatprep.mubr.bf16.mxu1 %v1229_v0  ;;  %v3856_v0 = vld [vmem:[%s5736_s4] ss:$0 sm:$0xff] }
 0x19a   : > { %4361 = vmatpush3.bf16.msra.mxu0 %v4691_v26  ;;  %v4737_v26 = vld [vmem:[%s5714_s13 + $0x18] sm:$0xff]  }
 0x19b   : > { %4362 = vmatprep.subr.bf16.mxu0 %v4693_v27  ;;  %4383 = vmatpush3.bf16.msra.mxu1 %v4692_v28  ;;  %v3421_v27 = vpack.c.bf16 %v3420_v24, %v3420_v24  ;;  %v4738_v28 = vld [vmem:[%s5714_s13 + $0x60] sm:$0xff]  }
 0x19c   : > { %4384 = vmatprep.subr.bf16.mxu1 %v4694_v29  ;;  %v4739_v29 = vld [vmem:[%s5714_s13 + $0x20] sm:$0xff]  }
 0x19e   : > { %4363 = vmatpush3.bf16.msra.mxu0 %v4695_v30  ;;  %v4740_v30 = vld [vmem:[%s5714_s13 + $0x68] sm:$0xff]  }
 0x19f   : > { %4364 = vmatprep.subr.bf16.mxu0 %v4697_v31  ;;  %4385 = vmatpush3.bf16.msra.mxu1 %v4696_v32  ;;  %v4741_v31 = vld [vmem:[%s5714_s13 + $0x28] sm:$0xff]   ;;  %v4742_v32 = vld [vmem:[%s5714_s13 + $0x70] sm:$0xff]  }
 0x1a0   : > { %4386 = vmatprep.subr.bf16.mxu1 %v4698_v33  ;;  %v4743_v33 = vld [vmem:[%s5714_s13 + $0x30] sm:$0xff]  }
 0x1a2   : > { %4365 = vmatpush3.bf16.msra.mxu0 %v4699_v34  ;;  %v4744_v34 = vld [vmem:[%s5714_s13 + $0x78] sm:$0xff]  }
 0x1a3   : > { %4366 = vmatprep.subr.bf16.mxu0 %v4701_v35  ;;  %4387 = vmatpush3.bf16.msra.mxu1 %v4700_v36  ;;  %v4745_v35 = vld [vmem:[%s5714_s13 + $0x38] sm:$0xff]   ;;  %v3519_v36 = vpack.c.bf16 %v4068_v19, %v4068_v19 }
 0x1a4   : > { %4388 = vmatprep.subr.bf16.mxu1 %v4702_v37 }
 0x1a6   : > { %4367 = vmatpush3.bf16.msra.mxu0 %v4703_v38  ;;  %v3858_v38 = vld [vmem:[%s5735_s28] ss:$0 sm:$0xff] }
 0x1a7   : > { %4368 = vmatprep.subr.bf16.mxu0 %v4705_v39  ;;  %4389 = vmatpush3.bf16.msra.mxu1 %v4704_v40 }
 0x1a8   : > { %4390 = vmatprep.subr.bf16.mxu1 %v4706_v42 }
 0x1aa   : > { %4369 = vmatpush3.bf16.msra.mxu0 %v4707_v43 }
 0x1ab   : > { %4370 = vmatprep.subr.bf16.mxu0 %v4709_v44  ;;  %4391 = vmatpush3.bf16.msra.mxu1 %v4708_v45 }
 0x1ac   : > { %4392 = vmatprep.subr.bf16.mxu1 %v4710_v46 }
 0x1ae   : > { %4371 = vmatpush3.bf16.msra.mxu0 %v4711_v47 }
 0x1af   : > { %4372 = vmatprep.subr.bf16.mxu0 %v4713_v48  ;;  %4393 = vmatpush3.bf16.msra.mxu1 %v4712_v49 }
 0x1b0   : > { %4394 = vmatprep.subr.bf16.mxu1 %v4714_v50 }
 0x1b2   : > { %4373 = vmatpush3.bf16.msra.mxu0 %v4715_v52 }
 0x1b3   : > { %4439 = vmatprep.subr.bf16.mxu0 %v4760_v63  ;;  %4395 = vmatpush3.bf16.msra.mxu1 %v4716_v55 }
 0x1b4   : > { %4451 = vmatprep.subr.bf16.mxu1 %v4760_v63 }
 0x1b5   : > { %3243 = vmatmul.mubr.bf16.vlgmr.msra.gmra.mrb[20].mxu0 %v1226_v58 }
 0x1b6   : > { %4440 = vmatpush3.bf16.msra.mxu0 %v4718_v61  ;;  %3283 = vmatmul.mubr.bf16.vlgmr.msra.gmra.mrb[20].mxu1 %v1228_v62 }
 0x1b7   : > { %4441 = vmatprep.subr.bf16.mxu0 %v4760_v63  ;;  %4452 = vmatpush3.bf16.msra.mxu1 %v4719_v41 }
 0x1b8   : > { %4447 = vmatprep.mubr.msk.bf16.mxu0 %vm4761_vm2, %v4760_v63  ;;  %4453 = vmatprep.subr.bf16.mxu1 %v4760_v63 }
 0x1b9   : > { %4459 = vmatprep.mubr.msk.bf16.mxu1 %vm4761_vm2, %v4760_v63 }
 0x1ba   : > { %4442 = vmatpush3.bf16.msra.mxu0 %v4720_v1 }
 0x1bb   : > { %4443 = vmatprep.subr.bf16.mxu0 %v4760_v63  ;;  %4454 = vmatpush3.bf16.msra.mxu1 %v4721_v2 }
 0x1bc   : > { %4455 = vmatprep.subr.bf16.mxu1 %v4760_v63 }
 0x1be   : > { %4444 = vmatpush3.bf16.msra.mxu0 %v4722_v3  ;;  %v4086_v3 = vld [vmem:[%s5716_s15] ss:$0 sm:$0xff] }
 0x1bf   : > { %4445 = vmatprep.subr.bf16.mxu0 %v4760_v63  ;;  %4456 = vmatpush3.bf16.msra.mxu1 %v4723_v4 }
 0x1c0   : > { %4457 = vmatprep.subr.bf16.mxu1 %v4760_v63 }
 0x1c2   : > { %4446 = vmatpush3.bf16.msra.mxu0 %v4724_v6 }
 0x1c3   : > { %4463 = vmatprep.subr.bf16.mxu0 %v4760_v63  ;;  %4458 = vmatpush3.bf16.msra.mxu1 %v4725_v7 }
 0x1c4   : > { %4417 = vmatprep.subr.bf16.mxu1 %v4726_v10 }
 0x1c5   : > { %4448 = vmatmul.mubr.msk.bf16.vlgmr.msra.gmra.mrb[24].mxu0 %vm2806_vm3, %v1230_v9 }
 0x1c6   : > { %4464 = vmatpush3.bf16.msra.mxu0 %v4727_v11  ;;  %4471 = vmatprep.mubr.msk.bf16.mxu0 %vm4761_vm2, %v4760_v63 }
 0x1c7   : > { %4460 = vmatmul.mubr.msk.bf16.vlgmr.msra.gmra.mrb[24].mxu1 %vm2806_vm3, %v3334_v12  ;;  %4465 = vmatprep.subr.bf16.mxu0 %v4760_v63 }
 0x1c8   : > { %4418 = vmatpush3.bf16.msra.mxu1 %v4728_v13  ;;  %3688 = vmatprep.mubr.bf16.mxu1 %v3520_v25 }
 0x1c9   : > { %4419 = vmatprep.subr.bf16.mxu1 %v4729_v14 }
 0x1ca   : > { %4466 = vmatpush3.bf16.msra.mxu0 %v4730_v15 }
 0x1cb   : > { %4467 = vmatprep.subr.bf16.mxu0 %v4760_v63 }
 0x1cc   : > { %4420 = vmatpush3.bf16.msra.mxu1 %v4731_v16 }
 0x1cd   : > { %4421 = vmatprep.subr.bf16.mxu1 %v4732_v17 }
 0x1ce   : > { %4468 = vmatpush3.bf16.msra.mxu0 %v4733_v18 }
 0x1cf   : > { %4469 = vmatprep.subr.bf16.mxu0 %v4760_v63  ;;  %v1046_v63 = vld [vmem:[#allocation2] sm:$0x3] }
 0x1d0   : > { %4422 = vmatpush3.bf16.msra.mxu1 %v4734_v20  ;;  %v1054_v41 = vadd.f32 %v3856_v0, %v1046_v63 }
 0x1d1   : > { %4423 = vmatprep.subr.bf16.mxu1 %v4735_v22 }
 0x1d2   : > { %4470 = vmatpush3.bf16.msra.mxu0 %v4736_v23  ;;  %v1056_v1 = vmul.f32 0.1, %v1054_v41  ;;  %vm1055_vm4 = vcmp.ge.f32.partialorder %v1054_v41, 0.0 }
 0x1d4   : > { %4424 = vmatpush3.bf16.msra.mxu1 %v4737_v26  ;;  %v1057_v2 = vsel %vm1055_vm4, %v1054_v41, %v1056_v1 }
 0x1d5   : > { %4472 = vmatmul.mubr.msk.bf16.vlgmr.msra.gmra.mrb[28].mxu0 %vm2806_vm3, %v3421_v27  ;;  %4425 = vmatprep.subr.bf16.mxu1 %v4738_v28  ;;  %v3706_v4 = vmul.f32 %v4086_v3, %v1057_v2 }
 0x1d7   : > { %v3707_v5 = vsel %vm1040_vm1, %v3706_v4, 0.0  ;;  %v4088_v4 = vld [vmem:[%s5718_s17] ss:$0 sm:$0xff] }
 0x1d8   : > { %4426 = vmatpush3.bf16.msra.mxu1 %v4739_v29  ;;  %3708 = vadd.xlane.f32.xlu0 %v3707_v5 }
 0x1d9   : > { %4427 = vmatprep.subr.bf16.mxu1 %v4740_v30 }
 0x1dc   : > { %4428 = vmatpush3.bf16.msra.mxu1 %v4741_v31 }
 0x1dd   : > { %4429 = vmatprep.subr.bf16.mxu1 %v4742_v32 }
 0x1e0   : > { %4430 = vmatpush3.bf16.msra.mxu1 %v4743_v33 }
 0x1e1   : > { %4431 = vmatprep.subr.bf16.mxu1 %v4744_v34 }
 0x1e4   : > { %4432 = vmatpush3.bf16.msra.mxu1 %v4745_v35 }
 0x1e7   : > { %3689 = vmatmul.mubr.bf16.vlgmr.msra.gmra.mrb[28].mxu1 %v3519_v36 }
 0x1e8   : > { %v4154_v37 = vpop.f32.mrb[0].mxu0 }
 0x1e9   : > { %v4155_v39 = vpop.f32.mrb[1].mxu0  ;;  %v4176_v40 = vpop.f32.mrb[0].mxu1 }
 0x1ea   : > { %v4156_v42 = vadd.f32 %v4155_v39, %v4154_v37  ;;  %v4157_v43 = vpop.f32.mrb[2].mxu0  ;;  %v4177_v44 = vpop.f32.mrb[1].mxu1 }
 0x1eb   : > { %v4158_v45 = vpop.f32.mrb[3].mxu0  ;;  %v4178_v47 = vadd.f32 %v4177_v44, %v4176_v40  ;;  %v4179_v48 = vpop.f32.mrb[2].mxu1 }
 0x1ec   : > { %v2845_v46 = vadd.f32 %v4156_v42, %v3858_v38  ;;  %v4180_v49 = vpop.f32.mrb[3].mxu1 }
 0x1ee   : > { %v2885_v50 = vadd.f32 %v4178_v47, %v2845_v46 }
 0x208   : > { %v4198_v51 = vpop.f32.mrb[4].mxu0 }
 0x209   : > { %v4199_v52 = vpop.f32.mrb[5].mxu0  ;;  %v4220_v53 = vpop.f32.mrb[4].mxu1 }
 0x20a   : > { %v4200_v54 = vadd.f32 %v4199_v52, %v4198_v51  ;;  %v4201_v55 = vpop.f32.mrb[6].mxu0  ;;  %v4221_v56 = vpop.f32.mrb[5].mxu1 }
 0x20b   : > { %v4202_v57 = vpop.f32.mrb[7].mxu0  ;;  %v4222_v59 = vadd.f32 %v4221_v56, %v4220_v53  ;;  %v4223_v60 = vpop.f32.mrb[6].mxu1  ;;  %v4056_v56 = vld [vmem:[%s5709_s8] ss:$0 sm:$0xff] }
 0x20c   : > { %v2925_v58 = vadd.f32 %v4200_v54, %v2885_v50  ;;  %v4224_v61 = vpop.f32.mrb[7].mxu1  ;;  %v4087_v60 = vld [vmem:[%s5717_s16] ss:$0 sm:$0xff] }
 0x20e   : > { %v2965_v62 = vadd.f32 %v4222_v59, %v2925_v58 }
 0x228   : > { %v4242_v6 = vpop.f32.mrb[8].mxu0 }
 0x229   : > { %v4243_v7 = vpop.f32.mrb[9].mxu0  ;;  %v4264_v8 = vpop.f32.mrb[8].mxu1 }
 0x22a   : > { %v4244_v9 = vadd.f32 %v4243_v7, %v4242_v6  ;;  %v4245_v10 = vpop.f32.mrb[10].mxu0  ;;  %v4265_v11 = vpop.f32.mrb[9].mxu1 }
 0x22b   : > { %v4246_v12 = vpop.f32.mrb[11].mxu0  ;;  %v4266_v14 = vadd.f32 %v4265_v11, %v4264_v8  ;;  %v4267_v15 = vpop.f32.mrb[10].mxu1  ;;  %v4062_v11 = vld [vmem:[%s5712_s11] ss:$0 sm:$0xff] }
 0x22c   : > { %v3005_v13 = vadd.f32 %v4244_v9, %v2965_v62  ;;  %v4268_v16 = vpop.f32.mrb[11].mxu1 }
 0x22e   : > { %v3045_v17 = vadd.f32 %v4266_v14, %v3005_v13 }
 0x248   : > { %v4286_v18 = vpop.f32.mrb[12].mxu0 }
 0x249   : > { %v4287_v19 = vpop.f32.mrb[13].mxu0  ;;  %v4308_v20 = vpop.f32.mrb[12].mxu1 }
 0x24a   : > { %v4288_v21 = vadd.f32 %v4287_v19, %v4286_v18  ;;  %v4289_v22 = vpop.f32.mrb[14].mxu0  ;;  %v4309_v23 = vpop.f32.mrb[13].mxu1 }
 0x24b   : > { %v4290_v24 = vpop.f32.mrb[15].mxu0  ;;  %v4310_v26 = vadd.f32 %v4309_v23, %v4308_v20  ;;  %v4311_v27 = vpop.f32.mrb[14].mxu1  ;;  %v4069_v23 = vld [vmem:[%s5715_s14] ss:$0 sm:$0xff] }
 0x24c   : > { %v3085_v25 = vadd.f32 %v4288_v21, %v3045_v17  ;;  %v4312_v28 = vpop.f32.mrb[15].mxu1  ;;  %v4089_v17 = vld [vmem:[%s5719_s18] ss:$0 sm:$0xff] }
 0x24e   : > { %v3125_v29 = vadd.f32 %v4310_v26, %v3085_v25 }
 0x268   : > { %v4330_v30 = vpop.f32.mrb[16].mxu0 }
 0x269   : > { %v4331_v31 = vpop.f32.mrb[17].mxu0  ;;  %v4352_v32 = vpop.f32.mrb[16].mxu1 }
 0x26a   : > { %v4332_v33 = vadd.f32 %v4331_v31, %v4330_v30  ;;  %v4333_v34 = vpop.f32.mrb[18].mxu0  ;;  %v4353_v35 = vpop.f32.mrb[17].mxu1  ;;  %v4090_v30 = vld [vmem:[%s5720_s19] ss:$0 sm:$0xff] }
 0x26b   : > { %v4334_v36 = vpop.f32.mrb[19].mxu0  ;;  %v4354_v38 = vadd.f32 %v4353_v35, %v4352_v32  ;;  %v4355_v39 = vpop.f32.mrb[18].mxu1 }
 0x26c   : > { %v3165_v37 = vadd.f32 %v4332_v33, %v3125_v29  ;;  %v4356_v40 = vpop.f32.mrb[19].mxu1  ;;  %v3709_v34 = vpop.xlane.xlu0 %3708 }
 0x26e   : > { %v3205_v42 = vadd.f32 %v4354_v38, %v3165_v37 }
 0x288   : > { %v4374_v43 = vpop.f32.mrb[20].mxu0 }
 0x289   : > { %v4375_v44 = vpop.f32.mrb[21].mxu0  ;;  %v4396_v45 = vpop.f32.mrb[20].mxu1 }
 0x28a   : > { %v4376_v46 = vadd.f32 %v4375_v44, %v4374_v43  ;;  %v4377_v47 = vpop.f32.mrb[22].mxu0  ;;  %v4397_v48 = vpop.f32.mrb[21].mxu1 }
 0x28b   : > { %v4378_v49 = vpop.f32.mrb[23].mxu0  ;;  %v4398_v51 = vadd.f32 %v4397_v48, %v4396_v45  ;;  %v4399_v52 = vpop.f32.mrb[22].mxu1 }
 0x28c   : > { %v3245_v50 = vadd.f32 %v4376_v46, %v3205_v42  ;;  %v4400_v53 = vpop.f32.mrb[23].mxu1  ;;  %v4091_v42 = vld [vmem:[#allocation3] ss:$0 sm:$0xff] }
 0x28e   : > { %v3285_v54 = vadd.f32 %v4398_v51, %v3245_v50 }
 0x298   : > { %v3324_v55 = vpop.f32.mrb[24].mxu0 }
 0x299   : > { %v3325_v57 = vadd.f32 %v3324_v55, %v3285_v54  ;;  %v4449_v58 = vpop.f32.mrb[25].mxu0 }
 0x29a   : > { %v3411_v59 = vpop.f32.mrb[24].mxu1  ;;  %v3327_v61 = vpop.f32.mrb[26].mxu0 }
 0x29b   : > { %v3331_v62 = vmul.f32 0.01, %v3325_v57  ;;  %v3412_v63 = vadd.f32 %v4056_v56, %v3411_v59  ;;  %v4461_v0 = vpop.f32.mrb[25].mxu1  ;;  %vm3330_vm5 = vcmp.ge.f32.partialorder %v3325_v57, 0.0  ;;  %v4450_v41 = vpop.f32.mrb[27].mxu0 }
 0x29c   : > { %v3414_v1 = vpop.f32.mrb[26].mxu1 }
 0x29d   : > { %v3418_v2 = vmul.f32 0.1, %v3412_v63  ;;  %v4462_v3 = vpop.f32.mrb[27].mxu1  ;;  %vm3417_vm6 = vcmp.ge.f32.partialorder %v3412_v63, 0.0  ;;  %v3332_v5 = vsel %vm3330_vm5, %v3325_v57, %v3331_v62 }
 0x29e   : > { %v3717_v6 = vmul.f32 %v4087_v60, %v3332_v5 }
 0x29f   : > { %v3419_v7 = vsel %vm3417_vm6, %v3412_v63, %v3418_v2 }
 0x2a0   : > { %v3729_v8 = vmul.f32 %v4088_v4, %v3419_v7  ;;  %v3718_v9 = vsel %vm1040_vm1, %v3717_v6, 0.0 }
 0x2a1   : > { %3719 = vadd.xlane.f32.xlu0 %v3718_v9 }
 0x2a2   : > { %v3730_v10 = vsel %vm1040_vm1, %v3729_v8, 0.0 }
 0x2a3   : > { %3731 = vadd.xlane.f32.xlu1 %v3730_v10 }
 0x2a8   : > { %v3498_v12 = vpop.f32.mrb[28].mxu0 }
 0x2a9   : > { %v3499_v13 = vadd.f32 %v4062_v11, %v3498_v12  ;;  %v4473_v14 = vpop.f32.mrb[29].mxu0 }
 0x2aa   : > { %v3501_v15 = vpop.f32.mrb[30].mxu0 }
 0x2ab   : > { %v3505_v16 = vmul.f32 0.1, %v3499_v13  ;;  %vm3504_vm7 = vcmp.ge.f32.partialorder %v3499_v13, 0.0  ;;  %v4474_v18 = vpop.f32.mrb[31].mxu0 }
 0x2ad   : > { %v3506_v19 = vsel %vm3504_vm7, %v3499_v13, %v3505_v16 }
 0x2ae   : > { %v3741_v20 = vmul.f32 %v4089_v17, %v3506_v19 }
 0x2b0   : > { %v3742_v21 = vsel %vm1040_vm1, %v3741_v20, 0.0 }
 0x2b1   : > { %3743 = vadd.xlane.f32.xlu1 %v3742_v21 }
 0x2ba   : > { %v4433_v22 = vpop.f32.mrb[28].mxu1 }
 0x2bb   : > { %v4434_v24 = vpop.f32.mrb[29].mxu1 }
 0x2bc   : > { %v4435_v25 = vadd.f32 %v4434_v24, %v4433_v22  ;;  %v4436_v26 = vpop.f32.mrb[30].mxu1 }
 0x2bd   : > { %v4437_v27 = vpop.f32.mrb[31].mxu1 }
 0x2be   : > { %v3691_v28 = vadd.f32 %v4435_v25, %v4069_v23 }
 0x2c0   : > { %vm3696_vm8 = vcmp.ge.f32.partialorder %v3691_v28, 0.0  ;;  %v3697_v29 = vmul.f32 0.1, %v3691_v28 }
 0x2c2   : > { %v3698_v31 = vsel %vm3696_vm8, %v3691_v28, %v3697_v29 }
 0x2c3   : > { %v3753_v32 = vmul.f32 %v4090_v30, %v3698_v31 }
 0x2c5   : > { %v3754_v33 = vsel %vm1040_vm1, %v3753_v32, 0.0 }
 0x2c6   : > { %3755 = vadd.xlane.f32.xlu0 %v3754_v33 }
 0x32e   : > { %v3720_v35 = vpop.xlane.xlu0 %3719 }
 0x32f   : > { %v3721_v37 = vadd.f32 %v3720_v35, %v3709_v34 }
 0x330   : > { %v3732_v36 = vpop.xlane.xlu1 %3731 }
 0x331   : > { %v3733_v39 = vadd.f32 %v3732_v36, %v3721_v37 }
 0x33e   : > { %v3744_v38 = vpop.xlane.xlu1 %3743 }
 0x33f   : > { %v3745_v40 = vadd.f32 %v3744_v38, %v3733_v39 }
 0x353   : > { %v3756_v43 = vpop.xlane.xlu0 %3755 }
 0x354   : > { %v3757_v44 = vadd.f32 %v3756_v43, %v3745_v40 }
 0x356   : > { %v3765_v45 = vadd.f32 %v4091_v42, %v3757_v44 }
 0x358   : > { %v3766_v46 = vsub.f32 0.0, %v3765_v45 }
 0x35a   : > { %v3767_v47 = vmul.f32 1.442695, %v3766_v46 }
 0x35c   : > { %4746 = vpow2.f32 %v3767_v47 }
 0x366   : > { %v4747_v48 = vpop.eup %4746 }
 0x367   : > { %v3769_v49 = vadd.f32 1.0, %v4747_v48 }
 0x369   : > { %4748 = vrcp.f32 %v3769_v49 }
 0x373   : > { %v4749_v50 = vpop.eup %4748 }
 0x374   : > { %3773 = vst.msk [vmem:[%s5722_s21] sm:$0x3] %vm3772_vm9, %v4749_v50 }
 0x375 PF: > { %s33_s26 = sadd.s32 1, %s4756_s26  }
 0x376   : > { %p30_p7 = scmp.ge.s32.totalorder %s33_s26, 5  }
 0x378   :  { %32 = sbr.rel (!%p30_p7) target bundleno = 7 (0x7), region = 141 }

</bundles_post_ra>
